<compile_context>
chip_gen: v6e
topology: v6e:2x2x1
jax: 0.10.0
libtpu: 0.0.40
codegen_flags: <defaults>
</compile_context>

<pallas_src>
import functools

import jax
import jax.numpy as jnp
from jax.experimental import pallas as pl
from jax.experimental.pallas import tpu as pltpu


def _round_up(x, m):
    return ((x + m - 1) // m) * m


# ---------------- fused conv + bias + ReLU + 2x2 max-pool kernel ---------------- #

def _conv_relu_pool_kernel(p_ref, w_ref, b_ref, o_ref):
    """p_ref: (4, F, T) pool-grouped im2col patches (one slab per 2x2 position),
    w_ref: (Cout, F), b_ref: (Cout, 1), o_ref: (Cout, T) pooled activation tile."""
    w = w_ref[...]
    m = jnp.dot(w, p_ref[0], preferred_element_type=jnp.float32)
    for i in range(1, 4):
        m = jnp.maximum(m, jnp.dot(w, p_ref[i], preferred_element_type=jnp.float32))
    # maxpool(relu(conv + b)) == relu(max_i conv_i + b)
    o_ref[...] = jnp.maximum(m + b_ref[...], 0.0).astype(o_ref.dtype)


def conv_relu_pool(a, wt, b_col, K, *, row_tile=2048):
    """'valid' conv (stride 1) + bias + ReLU + 2x2/2 max-pool, fused.

    a:     (Cin, N, H, W)   channel-major activation (lane-dense spatial axis)
    wt:    (Cout, K*K*Cin)  weights, feature order (kh, kw, ci)
    b_col: (Cout, 1)        bias
    returns (Cout, N, Hp, Wp) pooled activation.
    """
    Cin, N, H, W = a.shape
    Cout = wt.shape[0]
    Ho, Wo = H - K + 1, W - K + 1
    Hp, Wp = Ho // 2, Wo // 2
    F = K * K * Cin
    R = N * Hp * Wp
    Rpad = _round_up(R, 128)                                 # lane-dense, unmasked stores

    # XLA glue (data movement only): pool-grouped im2col, lane-dense (R last).
    # patches[i=(py,px), f=(kh,kw,ci), r=(b,hp,wp)] = a[ci, b, 2hp+py+kh, 2wp+px+kw]
    slabs = []
    for py in range(2):
        for px in range(2):
            feats = []
            for kh in range(K):
                for kw in range(K):
                    h0, w0 = py + kh, px + kw
                    feats.append(a[:, :, h0:h0 + 2 * Hp - 1:2, w0:w0 + 2 * Wp - 1:2])
            slabs.append(jnp.stack(feats, axis=0).reshape(F, R))
    patches = jnp.stack(slabs, axis=0)                       # (4, F, R)
    if Rpad != R:
        patches = jnp.pad(patches, ((0, 0), (0, 0), (0, Rpad - R)))

    # Row-tile over all pooled positions (batch collapsed into matmul rows).
    T = Rpad if Rpad <= 4096 else row_tile                   # full dim or 128-multiple tile
    grid = (pl.cdiv(Rpad, T),)

    out = pl.pallas_call(
        _conv_relu_pool_kernel,
        out_shape=jax.ShapeDtypeStruct((Cout, Rpad), jnp.float32),
        grid=grid,
        in_specs=[
            pl.BlockSpec((4, F, T), lambda j: (0, 0, j)),    # patch row-tile
            pl.BlockSpec((Cout, F), lambda j: (0, 0)),       # weights: VMEM-resident
            pl.BlockSpec((Cout, 1), lambda j: (0, 0)),       # bias:    VMEM-resident
        ],
        out_specs=pl.BlockSpec((Cout, T), lambda j: (0, j)), # lane-dense pooled output
        compiler_params=pltpu.CompilerParams(dimension_semantics=("parallel",)),
    )(patches, wt, b_col)
    return out[:, :R].reshape(Cout, N, Hp, Wp)


# --------------------------------- MLP head --------------------------------- #

def _mlp_kernel(x_ref, w1_ref, b1_ref, w2_ref, b2_ref, w3_ref, b3_ref, o_ref):
    h = jnp.dot(x_ref[...], w1_ref[...], preferred_element_type=jnp.float32) + b1_ref[...]
    h = jnp.maximum(h, 0.0)
    h = jnp.dot(h, w2_ref[...], preferred_element_type=jnp.float32) + b2_ref[...]
    h = jnp.maximum(h, 0.0)
    o_ref[...] = (jnp.dot(h, w3_ref[...], preferred_element_type=jnp.float32)
                  + b3_ref[...]).astype(o_ref.dtype)


def mlp_head(x, fc_params, *, batch_tile=512):
    (w1, b1), (w2, b2), (w3, b3) = fc_params   # already (in, out) / (1, out) layout
    N, D = x.shape
    TB = N if N <= 1024 else batch_tile
    grid = (pl.cdiv(N, TB),)

    def resident(arr):
        return pl.BlockSpec(arr.shape, lambda j: (0, 0))

    return pl.pallas_call(
        _mlp_kernel,
        out_shape=jax.ShapeDtypeStruct((N, w3.shape[1]), jnp.float32),
        grid=grid,
        in_specs=[pl.BlockSpec((TB, D), lambda j: (j, 0)),
                  resident(w1), resident(b1),
                  resident(w2), resident(b2),
                  resident(w3), resident(b3)],
        out_specs=pl.BlockSpec((TB, w3.shape[1]), lambda j: (j, 0)),
        compiler_params=pltpu.CompilerParams(dimension_semantics=("parallel",)),
    )(x, w1, b1, w2, b2, w3, b3)


# ------------------------------- full network -------------------------------- #

def net_forward(x_nchw, params):
    (c1w, c1b), (c2w, c2b), (c3w, c3b) = params["conv"]
    a = jnp.transpose(x_nchw, (1, 0, 2, 3))        # NCHW -> (Cin=1, N, 48, 48)
    a = conv_relu_pool(a, c1w, c1b, K=5)           # -> (6,  N, 22, 22)
    a = conv_relu_pool(a, c2w, c2b, K=3)           # -> (6,  N, 10, 10)
    a = conv_relu_pool(a, c3w, c3b, K=3)           # -> (16, N, 4, 4)
    n = a.shape[1]
    # flatten in torch NCHW order to match x.view(-1, 16*4*4)
    x = jnp.transpose(a, (1, 0, 2, 3)).reshape(n, -1)
    return mlp_head(x, params["fc"])               # (N, 3)


# ------------------------- params (one-time layout prep) --------------------- #

def prepare_params(torch_params):
    """One-time layout transform (hoisted out of the jitted forward):
    conv (Cout,Cin,K,K) -> (Cout, K*K*Cin) with feature order (kh,kw,ci);
    fc torch (out,in) -> (in,out); biases to broadcastable 2-D columns/rows."""
    conv = []
    for w, b in torch_params["conv"]:
        cout = w.shape[0]
        conv.append((jnp.transpose(w, (0, 2, 3, 1)).reshape(cout, -1),
                     b.reshape(cout, 1)))
    fc = tuple((jnp.transpose(w), b.reshape(1, -1)) for w, b in torch_params["fc"])
    return {"conv": tuple(conv), "fc": fc}


def init_torch_params(key):
    ks = jax.random.split(key, 12)

    def w(k, shape, scale):
        return jax.random.normal(k, shape, jnp.float32) * scale

    return {
        "conv": (
            (w(ks[0], (6, 1, 5, 5), 0.1), w(ks[1], (6,), 0.1)),
            (w(ks[2], (6, 6, 3, 3), 0.1), w(ks[3], (6,), 0.1)),
            (w(ks[4], (16, 6, 3, 3), 0.1), w(ks[5], (16,), 0.1)),
        ),
        "fc": (
            (w(ks[6], (120, 256), 0.05), w(ks[7], (120,), 0.05)),
            (w(ks[8], (48, 120), 0.05), w(ks[9], (48,), 0.05)),
            (w(ks[10], (3, 48), 0.05), w(ks[11], (3,), 0.05)),
        ),
    }


# ---------------------- pure-JAX reference (correctness) --------------------- #

def ref_forward(x, torch_params):
    hp = jax.lax.Precision.HIGHEST

    def conv(a, w, b):
        out = jax.lax.conv_general_dilated(
            a, w, (1, 1), "VALID",
            dimension_numbers=("NCHW", "OIHW", "NCHW"), precision=hp)
        return out + b.reshape(1, -1, 1, 1)

    def pool(a):
        return jax.lax.reduce_window(a, -jnp.inf, jax.lax.max,
                                     (1, 1, 2, 2), (1, 1, 2, 2), "VALID")

    (c1w, c1b), (c2w, c2b), (c3w, c3b) = torch_params["conv"]
    (f1w, f1b), (f2w, f2b), (f3w, f3b) = torch_params["fc"]
    a = pool(jax.nn.relu(conv(x, c1w, c1b)))
    a = pool(jax.nn.relu(conv(a, c2w, c2b)))
    a = pool(jax.nn.relu(conv(a, c3w, c3b)))
    h = a.reshape(a.shape[0], -1)
    h = jax.nn.relu(jnp.dot(h, f1w.T, precision=hp) + f1b)
    h = jax.nn.relu(jnp.dot(h, f2w.T, precision=hp) + f2b)
    return jnp.dot(h, f3w.T, precision=hp) + f3b


if __name__ == "__main__":
    key = jax.random.PRNGKey(0)
    pkey, xkey = jax.random.split(key)
    torch_params = init_torch_params(pkey)
    params = prepare_params(torch_params)
    # FER input: 48x48 grayscale (required by the 16*4*4 flatten), small batch.
    x = jax.random.normal(xkey, (2, 1, 48, 48), jnp.float32)

    fwd = jax.jit(functools.partial(net_forward, params=params))
    out = jax.block_until_ready(fwd(x))
    assert out.shape == (2, 3) and out.dtype == jnp.float32

    ref = jax.block_until_ready(ref_forward(x, torch_params))
    assert jnp.allclose(out, ref, rtol=2e-2, atol=2e-3), (out, ref)
    print("KERNEL_OK")
</pallas_src>

<mosaic_0001>
module attributes {stable_mosaic.version = 11 : i64} {
  func.func @_conv_relu_pool_kernel(%arg0: i32, %arg1: memref<4x25x1024xf32, #tpu.memory_space<vmem>>, %arg2: memref<6x25xf32, #tpu.memory_space<vmem>>, %arg3: memref<6x1xf32, #tpu.memory_space<vmem>>, %arg4: memref<6x1024xf32, #tpu.memory_space<vmem>>) attributes {dimension_semantics = [#tpu.dimension_semantics<parallel>], iteration_bounds = array<i64: 1>, scalar_prefetch = 0 : i64, scratch_operands = 0 : i64, tpu.core_type = #tpu.core_type<tc>, window_params = [{transform_indices = @transform_0, window_bounds = array<i64: 4, 25, 1024>}, {pipeline_mode = #tpu.pipeline_mode<synchronous>, transform_indices = @transform_1, window_bounds = array<i64: 6, 25>}, {pipeline_mode = #tpu.pipeline_mode<synchronous>, transform_indices = @transform_2, window_bounds = array<i64: 6, 1>}, {transform_indices = @transform_3, window_bounds = array<i64: 6, 1024>}]} {
    %c0 = arith.constant 0 : index
    %c0_0 = arith.constant 0 : index
    %0 = vector.load %arg2[%c0, %c0_0] : memref<6x25xf32, #tpu.memory_space<vmem>>, vector<6x25xf32>
    %c0_1 = arith.constant 0 : index
    %c0_2 = arith.constant 0 : index
    %c0_3 = arith.constant 0 : index
    %1 = vector.load %arg1[%c0_1, %c0_2, %c0_3] : memref<4x25x1024xf32, #tpu.memory_space<vmem>>, vector<1x25x1024xf32>
    %2 = vector.shape_cast %1 : vector<1x25x1024xf32> to vector<25x1024xf32>
    %cst = arith.constant dense<0.000000e+00> : vector<6x1024xf32>
    %3 = tpu.matmul %0, %2, %cst {dimension_numbers = #tpu.dot_dimension_numbers<[1], [0], [0], [1], [0, 0, 1, 1], [], []>} : vector<6x25xf32>, vector<25x1024xf32>, vector<6x1024xf32> -> vector<6x1024xf32>
    %c1 = arith.constant 1 : index
    %c0_4 = arith.constant 0 : index
    %c0_5 = arith.constant 0 : index
    %4 = vector.load %arg1[%c1, %c0_4, %c0_5] : memref<4x25x1024xf32, #tpu.memory_space<vmem>>, vector<1x25x1024xf32>
    %5 = vector.shape_cast %4 : vector<1x25x1024xf32> to vector<25x1024xf32>
    %cst_6 = arith.constant dense<0.000000e+00> : vector<6x1024xf32>
    %6 = tpu.matmul %0, %5, %cst_6 {dimension_numbers = #tpu.dot_dimension_numbers<[1], [0], [0], [1], [0, 0, 1, 1], [], []>} : vector<6x25xf32>, vector<25x1024xf32>, vector<6x1024xf32> -> vector<6x1024xf32>
    %7 = arith.maximumf %3, %6 : vector<6x1024xf32>
    %c2 = arith.constant 2 : index
    %c0_7 = arith.constant 0 : index
    %c0_8 = arith.constant 0 : index
    %8 = vector.load %arg1[%c2, %c0_7, %c0_8] : memref<4x25x1024xf32, #tpu.memory_space<vmem>>, vector<1x25x1024xf32>
    %9 = vector.shape_cast %8 : vector<1x25x1024xf32> to vector<25x1024xf32>
    %cst_9 = arith.constant dense<0.000000e+00> : vector<6x1024xf32>
    %10 = tpu.matmul %0, %9, %cst_9 {dimension_numbers = #tpu.dot_dimension_numbers<[1], [0], [0], [1], [0, 0, 1, 1], [], []>} : vector<6x25xf32>, vector<25x1024xf32>, vector<6x1024xf32> -> vector<6x1024xf32>
    %11 = arith.maximumf %7, %10 : vector<6x1024xf32>
    %c3 = arith.constant 3 : index
    %c0_10 = arith.constant 0 : index
    %c0_11 = arith.constant 0 : index
    %12 = vector.load %arg1[%c3, %c0_10, %c0_11] : memref<4x25x1024xf32, #tpu.memory_space<vmem>>, vector<1x25x1024xf32>
    %13 = vector.shape_cast %12 : vector<1x25x1024xf32> to vector<25x1024xf32>
    %cst_12 = arith.constant dense<0.000000e+00> : vector<6x1024xf32>
    %14 = tpu.matmul %0, %13, %cst_12 {dimension_numbers = #tpu.dot_dimension_numbers<[1], [0], [0], [1], [0, 0, 1, 1], [], []>} : vector<6x25xf32>, vector<25x1024xf32>, vector<6x1024xf32> -> vector<6x1024xf32>
    %15 = arith.maximumf %11, %14 : vector<6x1024xf32>
    %c0_13 = arith.constant 0 : index
    %c0_14 = arith.constant 0 : index
    %16 = vector.load %arg3[%c0_13, %c0_14] : memref<6x1xf32, #tpu.memory_space<vmem>>, vector<6x1xf32>
    %17 = vector.broadcast %16 : vector<6x1xf32> to vector<6x1024xf32>
    %18 = arith.addf %15, %17 : vector<6x1024xf32>
    %cst_15 = arith.constant 0.000000e+00 : f32
    %19 = vector.broadcast %cst_15 : f32 to vector<6x1024xf32>
    %20 = arith.maximumf %18, %19 : vector<6x1024xf32>
    %c0_16 = arith.constant 0 : index
    %c0_17 = arith.constant 0 : index
    %21 = vector.load %arg4[%c0_16, %c0_17] : memref<6x1024xf32, #tpu.memory_space<vmem>>, vector<6x1024xf32>
    tpu.vector_store %arg4[%c0_16, %c0_17], %20 {strides = array<i32>} : memref<6x1024xf32, #tpu.memory_space<vmem>>, vector<6x1024xf32>,
    return
  }
  func.func @transform_0(%arg0: i32) -> (i32, i32, i32) {
    %c0_i32 = arith.constant 0 : i32
    %c0_i32_0 = arith.constant 0 : i32
    %c0_i32_1 = arith.constant 0 : i32
    return %c0_i32, %c0_i32_0, %arg0 : i32, i32, i32
  }
  func.func @transform_1(%arg0: i32) -> (i32, i32) {
    %c0_i32 = arith.constant 0 : i32
    %c0_i32_0 = arith.constant 0 : i32
    %c0_i32_1 = arith.constant 0 : i32
    return %c0_i32, %c0_i32_0 : i32, i32
  }
  func.func @transform_2(%arg0: i32) -> (i32, i32) {
    %c0_i32 = arith.constant 0 : i32
    %c0_i32_0 = arith.constant 0 : i32
    %c0_i32_1 = arith.constant 0 : i32
    return %c0_i32, %c0_i32_0 : i32, i32
  }
  func.func @transform_3(%arg0: i32) -> (i32, i32) {
    %c0_i32 = arith.constant 0 : i32
    %c0_i32_0 = arith.constant 0 : i32
    return %c0_i32, %arg0 : i32, i32
  }
}

module attributes {stable_mosaic.version = 11 : i64} {
  func.func @_conv_relu_pool_kernel(%arg0: i32, %arg1: memref<4x54x256xf32, #tpu.memory_space<vmem>>, %arg2: memref<6x54xf32, #tpu.memory_space<vmem>>, %arg3: memref<6x1xf32, #tpu.memory_space<vmem>>, %arg4: memref<6x256xf32, #tpu.memory_space<vmem>>) attributes {dimension_semantics = [#tpu.dimension_semantics<parallel>], iteration_bounds = array<i64: 1>, scalar_prefetch = 0 : i64, scratch_operands = 0 : i64, tpu.core_type = #tpu.core_type<tc>, window_params = [{transform_indices = @transform_0, window_bounds = array<i64: 4, 54, 256>}, {pipeline_mode = #tpu.pipeline_mode<synchronous>, transform_indices = @transform_1, window_bounds = array<i64: 6, 54>}, {pipeline_mode = #tpu.pipeline_mode<synchronous>, transform_indices = @transform_2, window_bounds = array<i64: 6, 1>}, {transform_indices = @transform_3, window_bounds = array<i64: 6, 256>}]} {
    %c0 = arith.constant 0 : index
    %c0_0 = arith.constant 0 : index
    %0 = vector.load %arg2[%c0, %c0_0] : memref<6x54xf32, #tpu.memory_space<vmem>>, vector<6x54xf32>
    %c0_1 = arith.constant 0 : index
    %c0_2 = arith.constant 0 : index
    %c0_3 = arith.constant 0 : index
    %1 = vector.load %arg1[%c0_1, %c0_2, %c0_3] : memref<4x54x256xf32, #tpu.memory_space<vmem>>, vector<1x54x256xf32>
    %2 = vector.shape_cast %1 : vector<1x54x256xf32> to vector<54x256xf32>
    %cst = arith.constant dense<0.000000e+00> : vector<6x256xf32>
    %3 = tpu.matmul %0, %2, %cst {dimension_numbers = #tpu.dot_dimension_numbers<[1], [0], [0], [1], [0, 0, 1, 1], [], []>} : vector<6x54xf32>, vector<54x256xf32>, vector<6x256xf32> -> vector<6x256xf32>
    %c1 = arith.constant 1 : index
    %c0_4 = arith.constant 0 : index
    %c0_5 = arith.constant 0 : index
    %4 = vector.load %arg1[%c1, %c0_4, %c0_5] : memref<4x54x256xf32, #tpu.memory_space<vmem>>, vector<1x54x256xf32>
    %5 = vector.shape_cast %4 : vector<1x54x256xf32> to vector<54x256xf32>
    %cst_6 = arith.constant dense<0.000000e+00> : vector<6x256xf32>
    %6 = tpu.matmul %0, %5, %cst_6 {dimension_numbers = #tpu.dot_dimension_numbers<[1], [0], [0], [1], [0, 0, 1, 1], [], []>} : vector<6x54xf32>, vector<54x256xf32>, vector<6x256xf32> -> vector<6x256xf32>
    %7 = arith.maximumf %3, %6 : vector<6x256xf32>
    %c2 = arith.constant 2 : index
    %c0_7 = arith.constant 0 : index
    %c0_8 = arith.constant 0 : index
    %8 = vector.load %arg1[%c2, %c0_7, %c0_8] : memref<4x54x256xf32, #tpu.memory_space<vmem>>, vector<1x54x256xf32>
    %9 = vector.shape_cast %8 : vector<1x54x256xf32> to vector<54x256xf32>
    %cst_9 = arith.constant dense<0.000000e+00> : vector<6x256xf32>
    %10 = tpu.matmul %0, %9, %cst_9 {dimension_numbers = #tpu.dot_dimension_numbers<[1], [0], [0], [1], [0, 0, 1, 1], [], []>} : vector<6x54xf32>, vector<54x256xf32>, vector<6x256xf32> -> vector<6x256xf32>
    %11 = arith.maximumf %7, %10 : vector<6x256xf32>
    %c3 = arith.constant 3 : index
    %c0_10 = arith.constant 0 : index
    %c0_11 = arith.constant 0 : index
    %12 = vector.load %arg1[%c3, %c0_10, %c0_11] : memref<4x54x256xf32, #tpu.memory_space<vmem>>, vector<1x54x256xf32>
    %13 = vector.shape_cast %12 : vector<1x54x256xf32> to vector<54x256xf32>
    %cst_12 = arith.constant dense<0.000000e+00> : vector<6x256xf32>
    %14 = tpu.matmul %0, %13, %cst_12 {dimension_numbers = #tpu.dot_dimension_numbers<[1], [0], [0], [1], [0, 0, 1, 1], [], []>} : vector<6x54xf32>, vector<54x256xf32>, vector<6x256xf32> -> vector<6x256xf32>
    %15 = arith.maximumf %11, %14 : vector<6x256xf32>
    %c0_13 = arith.constant 0 : index
    %c0_14 = arith.constant 0 : index
    %16 = vector.load %arg3[%c0_13, %c0_14] : memref<6x1xf32, #tpu.memory_space<vmem>>, vector<6x1xf32>
    %17 = vector.broadcast %16 : vector<6x1xf32> to vector<6x256xf32>
    %18 = arith.addf %15, %17 : vector<6x256xf32>
    %cst_15 = arith.constant 0.000000e+00 : f32
    %19 = vector.broadcast %cst_15 : f32 to vector<6x256xf32>
    %20 = arith.maximumf %18, %19 : vector<6x256xf32>
    %c0_16 = arith.constant 0 : index
    %c0_17 = arith.constant 0 : index
    %21 = vector.load %arg4[%c0_16, %c0_17] : memref<6x256xf32, #tpu.memory_space<vmem>>, vector<6x256xf32>
    tpu.vector_store %arg4[%c0_16, %c0_17], %20 {strides = array<i32>} : memref<6x256xf32, #tpu.memory_space<vmem>>, vector<6x256xf32>,
    return
  }
  func.func @transform_0(%arg0: i32) -> (i32, i32, i32) {
    %c0_i32 = arith.constant 0 : i32
    %c0_i32_0 = arith.constant 0 : i32
    %c0_i32_1 = arith.constant 0 : i32
    return %c0_i32, %c0_i32_0, %arg0 : i32, i32, i32
  }
  func.func @transform_1(%arg0: i32) -> (i32, i32) {
    %c0_i32 = arith.constant 0 : i32
    %c0_i32_0 = arith.constant 0 : i32
    %c0_i32_1 = arith.constant 0 : i32
    return %c0_i32, %c0_i32_0 : i32, i32
  }
  func.func @transform_2(%arg0: i32) -> (i32, i32) {
    %c0_i32 = arith.constant 0 : i32
    %c0_i32_0 = arith.constant 0 : i32
    %c0_i32_1 = arith.constant 0 : i32
    return %c0_i32, %c0_i32_0 : i32, i32
  }
  func.func @transform_3(%arg0: i32) -> (i32, i32) {
    %c0_i32 = arith.constant 0 : i32
    %c0_i32_0 = arith.constant 0 : i32
    return %c0_i32, %arg0 : i32, i32
  }
}

module attributes {stable_mosaic.version = 11 : i64} {
  func.func @_conv_relu_pool_kernel(%arg0: i32, %arg1: memref<4x54x128xf32, #tpu.memory_space<vmem>>, %arg2: memref<16x54xf32, #tpu.memory_space<vmem>>, %arg3: memref<16x1xf32, #tpu.memory_space<vmem>>, %arg4: memref<16x128xf32, #tpu.memory_space<vmem>>) attributes {dimension_semantics = [#tpu.dimension_semantics<parallel>], iteration_bounds = array<i64: 1>, scalar_prefetch = 0 : i64, scratch_operands = 0 : i64, tpu.core_type = #tpu.core_type<tc>, window_params = [{transform_indices = @transform_0, window_bounds = array<i64: 4, 54, 128>}, {pipeline_mode = #tpu.pipeline_mode<synchronous>, transform_indices = @transform_1, window_bounds = array<i64: 16, 54>}, {pipeline_mode = #tpu.pipeline_mode<synchronous>, transform_indices = @transform_2, window_bounds = array<i64: 16, 1>}, {transform_indices = @transform_3, window_bounds = array<i64: 16, 128>}]} {
    %c0 = arith.constant 0 : index
    %c0_0 = arith.constant 0 : index
    %0 = vector.load %arg2[%c0, %c0_0] : memref<16x54xf32, #tpu.memory_space<vmem>>, vector<16x54xf32>
    %c0_1 = arith.constant 0 : index
    %c0_2 = arith.constant 0 : index
    %c0_3 = arith.constant 0 : index
    %1 = vector.load %arg1[%c0_1, %c0_2, %c0_3] : memref<4x54x128xf32, #tpu.memory_space<vmem>>, vector<1x54x128xf32>
    %2 = vector.shape_cast %1 : vector<1x54x128xf32> to vector<54x128xf32>
    %cst = arith.constant dense<0.000000e+00> : vector<16x128xf32>
    %3 = tpu.matmul %0, %2, %cst {dimension_numbers = #tpu.dot_dimension_numbers<[1], [0], [0], [1], [0, 0, 1, 1], [], []>} : vector<16x54xf32>, vector<54x128xf32>, vector<16x128xf32> -> vector<16x128xf32>
    %c1 = arith.constant 1 : index
    %c0_4 = arith.constant 0 : index
    %c0_5 = arith.constant 0 : index
    %4 = vector.load %arg1[%c1, %c0_4, %c0_5] : memref<4x54x128xf32, #tpu.memory_space<vmem>>, vector<1x54x128xf32>
    %5 = vector.shape_cast %4 : vector<1x54x128xf32> to vector<54x128xf32>
    %cst_6 = arith.constant dense<0.000000e+00> : vector<16x128xf32>
    %6 = tpu.matmul %0, %5, %cst_6 {dimension_numbers = #tpu.dot_dimension_numbers<[1], [0], [0], [1], [0, 0, 1, 1], [], []>} : vector<16x54xf32>, vector<54x128xf32>, vector<16x128xf32> -> vector<16x128xf32>
    %7 = arith.maximumf %3, %6 : vector<16x128xf32>
    %c2 = arith.constant 2 : index
    %c0_7 = arith.constant 0 : index
    %c0_8 = arith.constant 0 : index
    %8 = vector.load %arg1[%c2, %c0_7, %c0_8] : memref<4x54x128xf32, #tpu.memory_space<vmem>>, vector<1x54x128xf32>
    %9 = vector.shape_cast %8 : vector<1x54x128xf32> to vector<54x128xf32>
    %cst_9 = arith.constant dense<0.000000e+00> : vector<16x128xf32>
    %10 = tpu.matmul %0, %9, %cst_9 {dimension_numbers = #tpu.dot_dimension_numbers<[1], [0], [0], [1], [0, 0, 1, 1], [], []>} : vector<16x54xf32>, vector<54x128xf32>, vector<16x128xf32> -> vector<16x128xf32>
    %11 = arith.maximumf %7, %10 : vector<16x128xf32>
    %c3 = arith.constant 3 : index
    %c0_10 = arith.constant 0 : index
    %c0_11 = arith.constant 0 : index
    %12 = vector.load %arg1[%c3, %c0_10, %c0_11] : memref<4x54x128xf32, #tpu.memory_space<vmem>>, vector<1x54x128xf32>
    %13 = vector.shape_cast %12 : vector<1x54x128xf32> to vector<54x128xf32>
    %cst_12 = arith.constant dense<0.000000e+00> : vector<16x128xf32>
    %14 = tpu.matmul %0, %13, %cst_12 {dimension_numbers = #tpu.dot_dimension_numbers<[1], [0], [0], [1], [0, 0, 1, 1], [], []>} : vector<16x54xf32>, vector<54x128xf32>, vector<16x128xf32> -> vector<16x128xf32>
    %15 = arith.maximumf %11, %14 : vector<16x128xf32>
    %c0_13 = arith.constant 0 : index
    %c0_14 = arith.constant 0 : index
    %16 = vector.load %arg3[%c0_13, %c0_14] : memref<16x1xf32, #tpu.memory_space<vmem>>, vector<16x1xf32>
    %17 = vector.broadcast %16 : vector<16x1xf32> to vector<16x128xf32>
    %18 = arith.addf %15, %17 : vector<16x128xf32>
    %cst_15 = arith.constant 0.000000e+00 : f32
    %19 = vector.broadcast %cst_15 : f32 to vector<16x128xf32>
    %20 = arith.maximumf %18, %19 : vector<16x128xf32>
    %c0_16 = arith.constant 0 : index
    %c0_17 = arith.constant 0 : index
    %21 = vector.load %arg4[%c0_16, %c0_17] : memref<16x128xf32, #tpu.memory_space<vmem>>, vector<16x128xf32>
    tpu.vector_store %arg4[%c0_16, %c0_17], %20 {strides = array<i32>} : memref<16x128xf32, #tpu.memory_space<vmem>>, vector<16x128xf32>,
    return
  }
  func.func @transform_0(%arg0: i32) -> (i32, i32, i32) {
    %c0_i32 = arith.constant 0 : i32
    %c0_i32_0 = arith.constant 0 : i32
    %c0_i32_1 = arith.constant 0 : i32
    return %c0_i32, %c0_i32_0, %arg0 : i32, i32, i32
  }
  func.func @transform_1(%arg0: i32) -> (i32, i32) {
    %c0_i32 = arith.constant 0 : i32
    %c0_i32_0 = arith.constant 0 : i32
    %c0_i32_1 = arith.constant 0 : i32
    return %c0_i32, %c0_i32_0 : i32, i32
  }
  func.func @transform_2(%arg0: i32) -> (i32, i32) {
    %c0_i32 = arith.constant 0 : i32
    %c0_i32_0 = arith.constant 0 : i32
    %c0_i32_1 = arith.constant 0 : i32
    return %c0_i32, %c0_i32_0 : i32, i32
  }
  func.func @transform_3(%arg0: i32) -> (i32, i32) {
    %c0_i32 = arith.constant 0 : i32
    %c0_i32_0 = arith.constant 0 : i32
    return %c0_i32, %arg0 : i32, i32
  }
}

module attributes {stable_mosaic.version = 11 : i64} {
  func.func @_mlp_kernel(%arg0: i32, %arg1: memref<2x256xf32, #tpu.memory_space<vmem>>, %arg2: memref<256x120xf32, #tpu.memory_space<vmem>>, %arg3: memref<1x120xf32, #tpu.memory_space<vmem>>, %arg4: memref<120x48xf32, #tpu.memory_space<vmem>>, %arg5: memref<1x48xf32, #tpu.memory_space<vmem>>, %arg6: memref<48x3xf32, #tpu.memory_space<vmem>>, %arg7: memref<1x3xf32, #tpu.memory_space<vmem>>, %arg8: memref<2x3xf32, #tpu.memory_space<vmem>>) attributes {dimension_semantics = [#tpu.dimension_semantics<parallel>], iteration_bounds = array<i64: 1>, scalar_prefetch = 0 : i64, scratch_operands = 0 : i64, tpu.core_type = #tpu.core_type<tc>, window_params = [{transform_indices = @transform_0, window_bounds = array<i64: 2, 256>}, {pipeline_mode = #tpu.pipeline_mode<synchronous>, transform_indices = @transform_1, window_bounds = array<i64: 256, 120>}, {pipeline_mode = #tpu.pipeline_mode<synchronous>, transform_indices = @transform_2, window_bounds = array<i64: 1, 120>}, {pipeline_mode = #tpu.pipeline_mode<synchronous>, transform_indices = @transform_3, window_bounds = array<i64: 120, 48>}, {pipeline_mode = #tpu.pipeline_mode<synchronous>, transform_indices = @transform_4, window_bounds = array<i64: 1, 48>}, {pipeline_mode = #tpu.pipeline_mode<synchronous>, transform_indices = @transform_5, window_bounds = array<i64: 48, 3>}, {pipeline_mode = #tpu.pipeline_mode<synchronous>, transform_indices = @transform_6, window_bounds = array<i64: 1, 3>}, {transform_indices = @transform_7, window_bounds = array<i64: 2, 3>}]} {
    %c0 = arith.constant 0 : index
    %c0_0 = arith.constant 0 : index
    %0 = vector.load %arg1[%c0, %c0_0] : memref<2x256xf32, #tpu.memory_space<vmem>>, vector<2x256xf32>
    %c0_1 = arith.constant 0 : index
    %c0_2 = arith.constant 0 : index
    %1 = vector.load %arg2[%c0_1, %c0_2] : memref<256x120xf32, #tpu.memory_space<vmem>>, vector<256x120xf32>
    %cst = arith.constant dense<0.000000e+00> : vector<2x120xf32>
    %2 = tpu.matmul %0, %1, %cst {dimension_numbers = #tpu.dot_dimension_numbers<[1], [0], [0], [1], [0, 0, 1, 1], [], []>} : vector<2x256xf32>, vector<256x120xf32>, vector<2x120xf32> -> vector<2x120xf32>
    %c0_3 = arith.constant 0 : index
    %c0_4 = arith.constant 0 : index
    %3 = vector.load %arg3[%c0_3, %c0_4] : memref<1x120xf32, #tpu.memory_space<vmem>>, vector<1x120xf32>
    %4 = vector.broadcast %3 : vector<1x120xf32> to vector<2x120xf32>
    %5 = arith.addf %2, %4 : vector<2x120xf32>
    %cst_5 = arith.constant 0.000000e+00 : f32
    %6 = vector.broadcast %cst_5 : f32 to vector<2x120xf32>
    %7 = arith.maximumf %5, %6 : vector<2x120xf32>
    %c0_6 = arith.constant 0 : index
    %c0_7 = arith.constant 0 : index
    %8 = vector.load %arg4[%c0_6, %c0_7] : memref<120x48xf32, #tpu.memory_space<vmem>>, vector<120x48xf32>
    %cst_8 = arith.constant dense<0.000000e+00> : vector<2x48xf32>
    %9 = tpu.matmul %7, %8, %cst_8 {dimension_numbers = #tpu.dot_dimension_numbers<[1], [0], [0], [1], [0, 0, 1, 1], [], []>} : vector<2x120xf32>, vector<120x48xf32>, vector<2x48xf32> -> vector<2x48xf32>
    %c0_9 = arith.constant 0 : index
    %c0_10 = arith.constant 0 : index
    %10 = vector.load %arg5[%c0_9, %c0_10] : memref<1x48xf32, #tpu.memory_space<vmem>>, vector<1x48xf32>
    %11 = vector.broadcast %10 : vector<1x48xf32> to vector<2x48xf32>
    %12 = arith.addf %9, %11 : vector<2x48xf32>
    %cst_11 = arith.constant 0.000000e+00 : f32
    %13 = vector.broadcast %cst_11 : f32 to vector<2x48xf32>
    %14 = arith.maximumf %12, %13 : vector<2x48xf32>
    %c0_12 = arith.constant 0 : index
    %c0_13 = arith.constant 0 : index
    %15 = vector.load %arg6[%c0_12, %c0_13] : memref<48x3xf32, #tpu.memory_space<vmem>>, vector<48x3xf32>
    %cst_14 = arith.constant dense<0.000000e+00> : vector<2x3xf32>
    %16 = tpu.matmul %14, %15, %cst_14 {dimension_numbers = #tpu.dot_dimension_numbers<[1], [0], [0], [1], [0, 0, 1, 1], [], []>} : vector<2x48xf32>, vector<48x3xf32>, vector<2x3xf32> -> vector<2x3xf32>
    %c0_15 = arith.constant 0 : index
    %c0_16 = arith.constant 0 : index
    %17 = vector.load %arg7[%c0_15, %c0_16] : memref<1x3xf32, #tpu.memory_space<vmem>>, vector<1x3xf32>
    %18 = vector.broadcast %17 : vector<1x3xf32> to vector<2x3xf32>
    %19 = arith.addf %16, %18 : vector<2x3xf32>
    %c0_17 = arith.constant 0 : index
    %c0_18 = arith.constant 0 : index
    %20 = vector.load %arg8[%c0_17, %c0_18] : memref<2x3xf32, #tpu.memory_space<vmem>>, vector<2x3xf32>
    tpu.vector_store %arg8[%c0_17, %c0_18], %19 {strides = array<i32>} : memref<2x3xf32, #tpu.memory_space<vmem>>, vector<2x3xf32>,
    return
  }
  func.func @transform_0(%arg0: i32) -> (i32, i32) {
    %c0_i32 = arith.constant 0 : i32
    %c0_i32_0 = arith.constant 0 : i32
    return %arg0, %c0_i32 : i32, i32
  }
  func.func @transform_1(%arg0: i32) -> (i32, i32) {
    %c0_i32 = arith.constant 0 : i32
    %c0_i32_0 = arith.constant 0 : i32
    %c0_i32_1 = arith.constant 0 : i32
    return %c0_i32, %c0_i32_0 : i32, i32
  }
  func.func @transform_2(%arg0: i32) -> (i32, i32) {
    %c0_i32 = arith.constant 0 : i32
    %c0_i32_0 = arith.constant 0 : i32
    %c0_i32_1 = arith.constant 0 : i32
    return %c0_i32, %c0_i32_0 : i32, i32
  }
  func.func @transform_3(%arg0: i32) -> (i32, i32) {
    %c0_i32 = arith.constant 0 : i32
    %c0_i32_0 = arith.constant 0 : i32
    %c0_i32_1 = arith.constant 0 : i32
    return %c0_i32, %c0_i32_0 : i32, i32
  }
  func.func @transform_4(%arg0: i32) -> (i32, i32) {
    %c0_i32 = arith.constant 0 : i32
    %c0_i32_0 = arith.constant 0 : i32
    %c0_i32_1 = arith.constant 0 : i32
    return %c0_i32, %c0_i32_0 : i32, i32
  }
  func.func @transform_5(%arg0: i32) -> (i32, i32) {
    %c0_i32 = arith.constant 0 : i32
    %c0_i32_0 = arith.constant 0 : i32
    %c0_i32_1 = arith.constant 0 : i32
    return %c0_i32, %c0_i32_0 : i32, i32
  }
  func.func @transform_6(%arg0: i32) -> (i32, i32) {
    %c0_i32 = arith.constant 0 : i32
    %c0_i32_0 = arith.constant 0 : i32
    %c0_i32_1 = arith.constant 0 : i32
    return %c0_i32, %c0_i32_0 : i32, i32
  }
  func.func @transform_7(%arg0: i32) -> (i32, i32) {
    %c0_i32 = arith.constant 0 : i32
    %c0_i32_0 = arith.constant 0 : i32
    return %arg0, %c0_i32 : i32, i32
  }
}

</mosaic_0001>

<bundles_post_ra>
// kernel: net_forward.4
= control target key start
LH: loop header
LB: loop body
LE: loop exit
PB: predicated region body
PF: predicated region fallthrough
CT: control target
= control target key end

     0   :  { %vm51_vm0 = vcmask 1040384   ;;  %v1588_v3 = vmov 0.0   ;;  %vm47_vm1 = vcmask 203776   ;;  %s2106_s0 = inlined_call_operand.vmem [shape: f32[4,25,1024], index: 0, kind: input, shape index: {}]   ;;  %s2107_s1 = inlined_call_operand.vmem [shape: f32[6,25], index: 1, kind: input, shape index: {}]   ;;  %s2108_s2 = inlined_call_operand.vmem [shape: f32[6,1], index: 2, kind: input, shape index: {}]   ;;  %s2109_s3 = inlined_call_operand.vmem [shape: f32[6,1024], index: 3, kind: output, shape index: {}]  }
   0x1   :  { %v40_v0 = vld [vmem:[%s2106_s0 + $0xc8] sm:$0x1]  ;;  %v42_v1 = vld [vmem:[%s2106_s0 + $0xd8] sm:$0x1]  ;;  %v39_v2 = vld [vmem:[%s2106_s0 + $0xc0] sm:$0x1]  ;;  %140 = vmatprep.mubr.f32.mxu0 %v1588_v3  ;;  %211 = vmatprep.mubr.f32.mxu1 %v1588_v3 }
   0x2   :  { %1441 = vmatprep.subr.msk.mxu0 %vm51_vm0, %v40_v0  ;;  %1444 = vmatprep.subr.msk.mxu1 %vm51_vm0, %v42_v1  ;;  %v41_v4 = vld [vmem:[%s2106_s0 + $0xd0] sm:$0x1]  ;;  %v32_v5 = vld [vmem:[%s2106_s0 + $0x88] sm:$0xff]  ;;  %v34_v6 = vld [vmem:[%s2106_s0 + $0x98] sm:$0xff] }
   0x3   :  { %1442 = vmatpush1.msk.msra.mxu0 %vm51_vm0, %v39_v2  ;;  %1445 = vmatpush1.msk.msra.mxu1 %vm51_vm0, %v41_v4  ;;  %v31_v7 = vld [vmem:[%s2106_s0 + $0x80] sm:$0xff]  ;;  %v33_v8 = vld [vmem:[%s2106_s0 + $0x90] sm:$0xff]  ;;  %v24_v9 = vld [vmem:[%s2106_s0 + $0x48] sm:$0xff] }
   0x4   :  { %102 = vmatprep.subr.mxu0 %v32_v5  ;;  %173 = vmatprep.subr.mxu1 %v34_v6  ;;  %v26_v10 = vld [vmem:[%s2106_s0 + $0x58] sm:$0xff]  ;;  %v23_v11 = vld [vmem:[%s2106_s0 + $0x40] sm:$0xff]  ;;  %v25_v12 = vld [vmem:[%s2106_s0 + $0x50] sm:$0xff] }
   0x5   :  { %103 = vmatpush1.msra.mxu0 %v31_v7  ;;  %174 = vmatpush1.msra.mxu1 %v33_v8  ;;  %v16_v13 = vld [vmem:[%s2106_s0 + $0x8] sm:$0xff]  ;;  %v18_v14 = vld [vmem:[%s2106_s0 + $0x18] sm:$0xff]  ;;  %v15_v15 = vld [vmem:[%s2106_s0] sm:$0xff] }
   0x6   :  { %104 = vmatprep.subr.mxu0 %v24_v9  ;;  %175 = vmatprep.subr.mxu1 %v26_v10  ;;  %v17_v16 = vld [vmem:[%s2106_s0 + $0x10] sm:$0xff]  ;;  %v1667_v17 = vld [vmem:[%s2107_s1] sm:$0x3f]  ;;  %v44_v18 = vld [vmem:[%s2106_s0 + $0xe8] sm:$0x1] }
   0x7   :  { %105 = vmatpush1.msra.mxu0 %v23_v11  ;;  %176 = vmatpush1.msra.mxu1 %v25_v12  ;;  %v46_v19 = vld [vmem:[%s2106_s0 + $0xf8] sm:$0x1]  ;;  %v43_v20 = vld [vmem:[%s2106_s0 + $0xe0] sm:$0x1]  ;;  %v45_v21 = vld [vmem:[%s2106_s0 + $0xf0] sm:$0x1] }
   0x8   :  { %106 = vmatprep.subr.mxu0 %v16_v13  ;;  %177 = vmatprep.subr.mxu1 %v18_v14  ;;  %v36_v22 = vld [vmem:[%s2106_s0 + $0xa8] sm:$0xff]  ;;  %v38_v23 = vld [vmem:[%s2106_s0 + $0xb8] sm:$0xff]  ;;  %v35_v24 = vld [vmem:[%s2106_s0 + $0xa0] sm:$0xff] }
   0x9   :  { %107 = vmatpush1.msra.mxu0 %v15_v15  ;;  %178 = vmatpush1.msra.mxu1 %v17_v16  ;;  %v37_v25 = vld [vmem:[%s2106_s0 + $0xb0] sm:$0xff]  ;;  %v28_v26 = vld [vmem:[%s2106_s0 + $0x68] sm:$0xff]  ;;  %v30_v27 = vld [vmem:[%s2106_s0 + $0x78] sm:$0xff] }
   0xa   :  { %1443 = vmatmul.mubr.msk.f32.vlgmr.msra.gmra.mxu0 %vm47_vm1, %v1667_v17  ;;  %1446 = vmatmul.mubr.msk.f32.vlgmr.msra.gmra.mxu1 %vm47_vm1, %v1667_v17  ;;  %v27_v28 = vld [vmem:[%s2106_s0 + $0x60] sm:$0xff]  ;;  %v29_v29 = vld [vmem:[%s2106_s0 + $0x70] sm:$0xff]  ;;  %v20_v30 = vld [vmem:[%s2106_s0 + $0x28] sm:$0xff] }
   0xb   :  { %1447 = vmatprep.subr.msk.mxu0 %vm51_vm0, %v44_v18  ;;  %1450 = vmatprep.subr.msk.mxu1 %vm51_vm0, %v46_v19  ;;  %v22_v31 = vld [vmem:[%s2106_s0 + $0x38] sm:$0xff]  ;;  %v19_v32 = vld [vmem:[%s2106_s0 + $0x20] sm:$0xff]  ;;  %v21_v33 = vld [vmem:[%s2106_s0 + $0x30] sm:$0xff] }
   0xc   :  { %1448 = vmatpush1.msk.msra.mxu0 %vm51_vm0, %v43_v20  ;;  %1451 = vmatpush1.msk.msra.mxu1 %vm51_vm0, %v45_v21  ;;  %v1478_v34 = vld [vmem:[%s2106_s0 + $0x1c8] sm:$0x1]  ;;  %v1480_v35 = vld [vmem:[%s2106_s0 + $0x1d8] sm:$0x1]  ;;  %v1477_v36 = vld [vmem:[%s2106_s0 + $0x1c0] sm:$0x1] }
   0xd   :  { %244 = vmatprep.subr.mxu0 %v36_v22  ;;  %315 = vmatprep.subr.mxu1 %v38_v23  ;;  %v1479_v37 = vld [vmem:[%s2106_s0 + $0x1d0] sm:$0x1]  ;;  %v1470_v38 = vld [vmem:[%s2106_s0 + $0x188] sm:$0xff]  ;;  %v1472_v39 = vld [vmem:[%s2106_s0 + $0x198] sm:$0xff] }
   0xe   :  { %245 = vmatpush1.msra.mxu0 %v35_v24  ;;  %316 = vmatpush1.msra.mxu1 %v37_v25  ;;  %v1469_v40 = vld [vmem:[%s2106_s0 + $0x180] sm:$0xff]  ;;  %v1471_v41 = vld [vmem:[%s2106_s0 + $0x190] sm:$0xff]  ;;  %v1462_v42 = vld [vmem:[%s2106_s0 + $0x148] sm:$0xff] }
   0xf   :  { %246 = vmatprep.subr.mxu0 %v28_v26  ;;  %317 = vmatprep.subr.mxu1 %v30_v27  ;;  %v1464_v43 = vld [vmem:[%s2106_s0 + $0x158] sm:$0xff]  ;;  %v1461_v44 = vld [vmem:[%s2106_s0 + $0x140] sm:$0xff]  ;;  %v1463_v45 = vld [vmem:[%s2106_s0 + $0x150] sm:$0xff] }
  0x10   :  { %247 = vmatpush1.msra.mxu0 %v27_v28  ;;  %318 = vmatpush1.msra.mxu1 %v29_v29  ;;  %v1454_v46 = vld [vmem:[%s2106_s0 + $0x108] sm:$0xff]  ;;  %v1456_v47 = vld [vmem:[%s2106_s0 + $0x118] sm:$0xff]  ;;  %v1453_v48 = vld [vmem:[%s2106_s0 + $0x100] sm:$0xff] }
  0x11   :  { %248 = vmatprep.subr.mxu0 %v20_v30  ;;  %319 = vmatprep.subr.mxu1 %v22_v31  ;;  %v1455_v49 = vld [vmem:[%s2106_s0 + $0x110] sm:$0xff]  ;;  %v1482_v50 = vld [vmem:[%s2106_s0 + $0x1e8] sm:$0x1]  ;;  %v1484_v51 = vld [vmem:[%s2106_s0 + $0x1f8] sm:$0x1] }
  0x12   :  { %249 = vmatpush1.msra.mxu0 %v19_v32  ;;  %282 = vmatprep.mubr.f32.mxu0 %v1588_v3  ;;  %v1481_v52 = vld [vmem:[%s2106_s0 + $0x1e0] sm:$0x1]  ;;  %v1483_v53 = vld [vmem:[%s2106_s0 + $0x1f0] sm:$0x1]  ;;  %v1474_v54 = vld [vmem:[%s2106_s0 + $0x1a8] sm:$0xff] }
  0x13   :  { %320 = vmatpush1.msra.mxu1 %v21_v33  ;;  %353 = vmatprep.mubr.f32.mxu1 %v1588_v3  ;;  %v1476_v55 = vld [vmem:[%s2106_s0 + $0x1b8] sm:$0xff]  ;;  %v1473_v56 = vld [vmem:[%s2106_s0 + $0x1a0] sm:$0xff]  ;;  %v1475_v57 = vld [vmem:[%s2106_s0 + $0x1b0] sm:$0xff] }
  0x14   :  { %1449 = vmatmul.mubr.msk.f32.vlgmr.msra.gmra.mxu0 %vm47_vm1, %v1667_v17  ;;  %1452 = vmatmul.mubr.msk.f32.vlgmr.msra.gmra.mxu1 %vm47_vm1, %v1667_v17  ;;  %v1466_v58 = vld [vmem:[%s2106_s0 + $0x168] sm:$0xff]  ;;  %v1468_v59 = vld [vmem:[%s2106_s0 + $0x178] sm:$0xff]  ;;  %v1465_v60 = vld [vmem:[%s2106_s0 + $0x160] sm:$0xff] }
  0x15   :  { %1485 = vmatprep.subr.msk.mxu0 %vm51_vm0, %v1478_v34  ;;  %1488 = vmatprep.subr.msk.mxu1 %vm51_vm0, %v1480_v35  ;;  %v1467_v61 = vld [vmem:[%s2106_s0 + $0x170] sm:$0xff]  ;;  %v1458_v62 = vld [vmem:[%s2106_s0 + $0x128] sm:$0xff]  ;;  %v1460_v63 = vld [vmem:[%s2106_s0 + $0x138] sm:$0xff] }
  0x16   :  { %1486 = vmatpush1.msk.msra.mxu0 %vm51_vm0, %v1477_v36  ;;  %1489 = vmatpush1.msk.msra.mxu1 %vm51_vm0, %v1479_v37  ;;  %v1457_v0 = vld [vmem:[%s2106_s0 + $0x120] sm:$0xff]  ;;  %v1459_v1 = vld [vmem:[%s2106_s0 + $0x130] sm:$0xff]  ;;  %v1522_v2 = vld [vmem:[%s2106_s0 + $0x2c8] sm:$0x1] }
  0x17   :  { %443 = vmatprep.subr.mxu0 %v1470_v38  ;;  %514 = vmatprep.subr.mxu1 %v1472_v39  ;;  %v1524_v4 = vld [vmem:[%s2106_s0 + $0x2d8] sm:$0x1]  ;;  %v1521_v5 = vld [vmem:[%s2106_s0 + $0x2c0] sm:$0x1]  ;;  %v1523_v6 = vld [vmem:[%s2106_s0 + $0x2d0] sm:$0x1] }
  0x18   :  { %444 = vmatpush1.msra.mxu0 %v1469_v40  ;;  %515 = vmatpush1.msra.mxu1 %v1471_v41  ;;  %v1514_v7 = vld [vmem:[%s2106_s0 + $0x288] sm:$0xff]  ;;  %v1516_v8 = vld [vmem:[%s2106_s0 + $0x298] sm:$0xff]  ;;  %v1513_v9 = vld [vmem:[%s2106_s0 + $0x280] sm:$0xff] }
  0x19   :  { %445 = vmatprep.subr.mxu0 %v1462_v42  ;;  %516 = vmatprep.subr.mxu1 %v1464_v43  ;;  %v1515_v10 = vld [vmem:[%s2106_s0 + $0x290] sm:$0xff]  ;;  %v1506_v11 = vld [vmem:[%s2106_s0 + $0x248] sm:$0xff]  ;;  %v1508_v12 = vld [vmem:[%s2106_s0 + $0x258] sm:$0xff] }
  0x1a   :  { %446 = vmatpush1.msra.mxu0 %v1461_v44  ;;  %517 = vmatpush1.msra.mxu1 %v1463_v45  ;;  %v1505_v13 = vld [vmem:[%s2106_s0 + $0x240] sm:$0xff]  ;;  %v1507_v14 = vld [vmem:[%s2106_s0 + $0x250] sm:$0xff]  ;;  %v1498_v15 = vld [vmem:[%s2106_s0 + $0x208] sm:$0xff] }
  0x1b   :  { %447 = vmatprep.subr.mxu0 %v1454_v46  ;;  %518 = vmatprep.subr.mxu1 %v1456_v47  ;;  %v1500_v16 = vld [vmem:[%s2106_s0 + $0x218] sm:$0xff]  ;;  %v1497_v18 = vld [vmem:[%s2106_s0 + $0x200] sm:$0xff]  ;;  %v1499_v19 = vld [vmem:[%s2106_s0 + $0x210] sm:$0xff] }
  0x1c   :  { %448 = vmatpush1.msra.mxu0 %v1453_v48  ;;  %481 = vmatprep.mubr.f32.mxu0 %v1588_v3  ;;  %v1526_v20 = vld [vmem:[%s2106_s0 + $0x2e8] sm:$0x1]  ;;  %v1528_v21 = vld [vmem:[%s2106_s0 + $0x2f8] sm:$0x1]  ;;  %v1525_v22 = vld [vmem:[%s2106_s0 + $0x2e0] sm:$0x1] }
  0x1d   :  { %519 = vmatpush1.msra.mxu1 %v1455_v49  ;;  %552 = vmatprep.mubr.f32.mxu1 %v1588_v3  ;;  %v1527_v23 = vld [vmem:[%s2106_s0 + $0x2f0] sm:$0x1]  ;;  %v1518_v24 = vld [vmem:[%s2106_s0 + $0x2a8] sm:$0xff]  ;;  %v1520_v25 = vld [vmem:[%s2106_s0 + $0x2b8] sm:$0xff] }
  0x1e   :  { %1487 = vmatmul.mubr.msk.f32.vlgmr.msra.gmra.mxu0 %vm47_vm1, %v1667_v17  ;;  %1490 = vmatmul.mubr.msk.f32.vlgmr.msra.gmra.mxu1 %vm47_vm1, %v1667_v17  ;;  %v1517_v26 = vld [vmem:[%s2106_s0 + $0x2a0] sm:$0xff]  ;;  %v1519_v27 = vld [vmem:[%s2106_s0 + $0x2b0] sm:$0xff]  ;;  %v1510_v28 = vld [vmem:[%s2106_s0 + $0x268] sm:$0xff] }
  0x1f   :  { %1491 = vmatprep.subr.msk.mxu0 %vm51_vm0, %v1482_v50  ;;  %1494 = vmatprep.subr.msk.mxu1 %vm51_vm0, %v1484_v51  ;;  %v1512_v29 = vld [vmem:[%s2106_s0 + $0x278] sm:$0xff]  ;;  %v1509_v30 = vld [vmem:[%s2106_s0 + $0x260] sm:$0xff]  ;;  %v1511_v31 = vld [vmem:[%s2106_s0 + $0x270] sm:$0xff] }
  0x20   :  { %1492 = vmatpush1.msk.msra.mxu0 %vm51_vm0, %v1481_v52  ;;  %1495 = vmatpush1.msk.msra.mxu1 %vm51_vm0, %v1483_v53  ;;  %v1502_v32 = vld [vmem:[%s2106_s0 + $0x228] sm:$0xff]  ;;  %v1504_v33 = vld [vmem:[%s2106_s0 + $0x238] sm:$0xff]  ;;  %v1501_v34 = vld [vmem:[%s2106_s0 + $0x220] sm:$0xff] }
  0x21   :  { %585 = vmatprep.subr.mxu0 %v1474_v54  ;;  %656 = vmatprep.subr.mxu1 %v1476_v55  ;;  %v1503_v35 = vld [vmem:[%s2106_s0 + $0x230] sm:$0xff]  ;;  %v1566_v36 = vld [vmem:[%s2106_s0 + $0x3c8] sm:$0x1]  ;;  %v1568_v37 = vld [vmem:[%s2106_s0 + $0x3d8] sm:$0x1] }
  0x22   :  { %586 = vmatpush1.msra.mxu0 %v1473_v56  ;;  %657 = vmatpush1.msra.mxu1 %v1475_v57  ;;  %v1565_v38 = vld [vmem:[%s2106_s0 + $0x3c0] sm:$0x1]  ;;  %v1567_v39 = vld [vmem:[%s2106_s0 + $0x3d0] sm:$0x1]  ;;  %v1558_v40 = vld [vmem:[%s2106_s0 + $0x388] sm:$0xff] }
  0x23   :  { %587 = vmatprep.subr.mxu0 %v1466_v58  ;;  %658 = vmatprep.subr.mxu1 %v1468_v59  ;;  %v1560_v41 = vld [vmem:[%s2106_s0 + $0x398] sm:$0xff]  ;;  %v1557_v42 = vld [vmem:[%s2106_s0 + $0x380] sm:$0xff]  ;;  %v1559_v43 = vld [vmem:[%s2106_s0 + $0x390] sm:$0xff] }
  0x24   :  { %588 = vmatpush1.msra.mxu0 %v1465_v60  ;;  %659 = vmatpush1.msra.mxu1 %v1467_v61  ;;  %v1550_v44 = vld [vmem:[%s2106_s0 + $0x348] sm:$0xff]  ;;  %v1552_v45 = vld [vmem:[%s2106_s0 + $0x358] sm:$0xff]  ;;  %v1549_v46 = vld [vmem:[%s2106_s0 + $0x340] sm:$0xff] }
  0x25   :  { %589 = vmatprep.subr.mxu0 %v1458_v62  ;;  %660 = vmatprep.subr.mxu1 %v1460_v63  ;;  %v1551_v47 = vld [vmem:[%s2106_s0 + $0x350] sm:$0xff]  ;;  %v1542_v48 = vld [vmem:[%s2106_s0 + $0x308] sm:$0xff]  ;;  %v1544_v49 = vld [vmem:[%s2106_s0 + $0x318] sm:$0xff] }
  0x26   :  { %590 = vmatpush1.msra.mxu0 %v1457_v0  ;;  %623 = vmatprep.mubr.f32.mxu0 %v1588_v3  ;;  %v1541_v50 = vld [vmem:[%s2106_s0 + $0x300] sm:$0xff]  ;;  %v1543_v51 = vld [vmem:[%s2106_s0 + $0x310] sm:$0xff]  ;;  %v1570_v52 = vld [vmem:[%s2106_s0 + $0x3e8] sm:$0x1] }
  0x27   :  { %661 = vmatpush1.msra.mxu1 %v1459_v1  ;;  %694 = vmatprep.mubr.f32.mxu1 %v1588_v3  ;;  %v1572_v53 = vld [vmem:[%s2106_s0 + $0x3f8] sm:$0x1]  ;;  %v1569_v54 = vld [vmem:[%s2106_s0 + $0x3e0] sm:$0x1]  ;;  %v1571_v55 = vld [vmem:[%s2106_s0 + $0x3f0] sm:$0x1] }
  0x28   :  { %1493 = vmatmul.mubr.msk.f32.vlgmr.msra.gmra.mxu0 %vm47_vm1, %v1667_v17  ;;  %1496 = vmatmul.mubr.msk.f32.vlgmr.msra.gmra.mxu1 %vm47_vm1, %v1667_v17  ;;  %v1562_v56 = vld [vmem:[%s2106_s0 + $0x3a8] sm:$0xff]  ;;  %v1564_v57 = vld [vmem:[%s2106_s0 + $0x3b8] sm:$0xff]  ;;  %v1561_v58 = vld [vmem:[%s2106_s0 + $0x3a0] sm:$0xff] }
  0x29   :  { %1529 = vmatprep.subr.msk.mxu0 %vm51_vm0, %v1522_v2  ;;  %1532 = vmatprep.subr.msk.mxu1 %vm51_vm0, %v1524_v4  ;;  %v1563_v59 = vld [vmem:[%s2106_s0 + $0x3b0] sm:$0xff]  ;;  %v1554_v60 = vld [vmem:[%s2106_s0 + $0x368] sm:$0xff]  ;;  %v1556_v61 = vld [vmem:[%s2106_s0 + $0x378] sm:$0xff] }
  0x2a   :  { %1530 = vmatpush1.msk.msra.mxu0 %vm51_vm0, %v1521_v5  ;;  %1533 = vmatpush1.msk.msra.mxu1 %vm51_vm0, %v1523_v6  ;;  %v1553_v62 = vld [vmem:[%s2106_s0 + $0x360] sm:$0xff]  ;;  %v1555_v63 = vld [vmem:[%s2106_s0 + $0x370] sm:$0xff]  ;;  %v1546_v0 = vld [vmem:[%s2106_s0 + $0x328] sm:$0xff]  ;;  %v1589_v6 = vmov 0  }
  0x2b   :  { %792 = vmatprep.subr.mxu0 %v1514_v7  ;;  %863 = vmatprep.subr.mxu1 %v1516_v8  ;;  %v1548_v1 = vld [vmem:[%s2106_s0 + $0x338] sm:$0xff]  ;;  %v1545_v2 = vld [vmem:[%s2106_s0 + $0x320] sm:$0xff]  ;;  %v1547_v4 = vld [vmem:[%s2106_s0 + $0x330] sm:$0xff] }
  0x2c   :  { %793 = vmatpush1.msra.mxu0 %v1513_v9  ;;  %864 = vmatpush1.msra.mxu1 %v1515_v10  ;;  %v1407_v5 = vld [vmem:[%s2108_s2] sm:$0x3f] }
  0x2d   :  { %794 = vmatprep.subr.mxu0 %v1506_v11  ;;  %865 = vmatprep.subr.mxu1 %v1508_v12 }
  0x2e   :  { %795 = vmatpush1.msra.mxu0 %v1505_v13  ;;  %866 = vmatpush1.msra.mxu1 %v1507_v14 }
  0x2f   :  { %796 = vmatprep.subr.mxu0 %v1498_v15  ;;  %867 = vmatprep.subr.mxu1 %v1500_v16 }
  0x30   :  { %797 = vmatpush1.msra.mxu0 %v1497_v18  ;;  %830 = vmatprep.mubr.f32.mxu0 %v1588_v3 }
  0x31   :  { %868 = vmatpush1.msra.mxu1 %v1499_v19  ;;  %901 = vmatprep.mubr.f32.mxu1 %v1588_v3 }
  0x32   :  { %1531 = vmatmul.mubr.msk.f32.vlgmr.msra.gmra.mxu0 %vm47_vm1, %v1667_v17  ;;  %1534 = vmatmul.mubr.msk.f32.vlgmr.msra.gmra.mxu1 %vm47_vm1, %v1667_v17 }
  0x33   :  { %1535 = vmatprep.subr.msk.mxu0 %vm51_vm0, %v1526_v20  ;;  %1538 = vmatprep.subr.msk.mxu1 %vm51_vm0, %v1528_v21 }
  0x34   :  { %1536 = vmatpush1.msk.msra.mxu0 %vm51_vm0, %v1525_v22  ;;  %1539 = vmatpush1.msk.msra.mxu1 %vm51_vm0, %v1527_v23 }
  0x35   :  { %934 = vmatprep.subr.mxu0 %v1518_v24  ;;  %1005 = vmatprep.subr.mxu1 %v1520_v25 }
  0x36   :  { %935 = vmatpush1.msra.mxu0 %v1517_v26  ;;  %1006 = vmatpush1.msra.mxu1 %v1519_v27 }
  0x37   :  { %936 = vmatprep.subr.mxu0 %v1510_v28  ;;  %1007 = vmatprep.subr.mxu1 %v1512_v29 }
  0x38   :  { %937 = vmatpush1.msra.mxu0 %v1509_v30  ;;  %1008 = vmatpush1.msra.mxu1 %v1511_v31 }
  0x39   :  { %938 = vmatprep.subr.mxu0 %v1502_v32  ;;  %1009 = vmatprep.subr.mxu1 %v1504_v33 }
  0x3a   :  { %939 = vmatpush1.msra.mxu0 %v1501_v34  ;;  %972 = vmatprep.mubr.f32.mxu0 %v1588_v3 }
  0x3b   :  { %1010 = vmatpush1.msra.mxu1 %v1503_v35  ;;  %1043 = vmatprep.mubr.f32.mxu1 %v1588_v3 }
  0x3c   :  { %1537 = vmatmul.mubr.msk.f32.vlgmr.msra.gmra.mxu0 %vm47_vm1, %v1667_v17  ;;  %1540 = vmatmul.mubr.msk.f32.vlgmr.msra.gmra.mxu1 %vm47_vm1, %v1667_v17 }
  0x3d   :  { %1573 = vmatprep.subr.msk.mxu0 %vm51_vm0, %v1566_v36  ;;  %1576 = vmatprep.subr.msk.mxu1 %vm51_vm0, %v1568_v37 }
  0x3e   :  { %1574 = vmatpush1.msk.msra.mxu0 %vm51_vm0, %v1565_v38  ;;  %1577 = vmatpush1.msk.msra.mxu1 %vm51_vm0, %v1567_v39 }
  0x3f   :  { %1141 = vmatprep.subr.mxu0 %v1558_v40  ;;  %1212 = vmatprep.subr.mxu1 %v1560_v41 }
  0x40   :  { %1142 = vmatpush1.msra.mxu0 %v1557_v42  ;;  %1213 = vmatpush1.msra.mxu1 %v1559_v43 }
  0x41   :  { %1143 = vmatprep.subr.mxu0 %v1550_v44  ;;  %1214 = vmatprep.subr.mxu1 %v1552_v45 }
  0x42   :  { %1144 = vmatpush1.msra.mxu0 %v1549_v46  ;;  %1215 = vmatpush1.msra.mxu1 %v1551_v47 }
  0x43   :  { %1145 = vmatprep.subr.mxu0 %v1542_v48  ;;  %1216 = vmatprep.subr.mxu1 %v1544_v49 }
  0x44   :  { %1146 = vmatpush1.msra.mxu0 %v1541_v50  ;;  %1179 = vmatprep.mubr.f32.mxu0 %v1588_v3 }
  0x45   :  { %1217 = vmatpush1.msra.mxu1 %v1543_v51  ;;  %1250 = vmatprep.mubr.f32.mxu1 %v1588_v3 }
  0x46   :  { %1575 = vmatmul.mubr.msk.f32.vlgmr.msra.gmra.mxu0 %vm47_vm1, %v1667_v17  ;;  %1578 = vmatmul.mubr.msk.f32.vlgmr.msra.gmra.mxu1 %vm47_vm1, %v1667_v17 }
  0x47   :  { %1579 = vmatprep.subr.msk.mxu0 %vm51_vm0, %v1570_v52  ;;  %1582 = vmatprep.subr.msk.mxu1 %vm51_vm0, %v1572_v53 }
  0x48   :  { %1580 = vmatpush1.msk.msra.mxu0 %vm51_vm0, %v1569_v54  ;;  %1583 = vmatpush1.msk.msra.mxu1 %vm51_vm0, %v1571_v55 }
  0x49   :  { %1283 = vmatprep.subr.mxu0 %v1562_v56  ;;  %1354 = vmatprep.subr.mxu1 %v1564_v57 }
  0x4a   :  { %1284 = vmatpush1.msra.mxu0 %v1561_v58  ;;  %1355 = vmatpush1.msra.mxu1 %v1563_v59 }
  0x4b   :  { %1285 = vmatprep.subr.mxu0 %v1554_v60  ;;  %1356 = vmatprep.subr.mxu1 %v1556_v61 }
  0x4c   :  { %1286 = vmatpush1.msra.mxu0 %v1553_v62  ;;  %1357 = vmatpush1.msra.mxu1 %v1555_v63 }
  0x4d   :  { %1287 = vmatprep.subr.mxu0 %v1546_v0  ;;  %1358 = vmatprep.subr.mxu1 %v1548_v1 }
  0x4e   :  { %1288 = vmatpush1.msra.mxu0 %v1545_v2  ;;  %1321 = vmatprep.mubr.f32.mxu0 %v1588_v3 }
  0x4f   :  { %1359 = vmatpush1.msra.mxu1 %v1547_v4  ;;  %1392 = vmatprep.mubr.f32.mxu1 %v1588_v3 }
  0x50   :  { %1581 = vmatmul.mubr.msk.f32.vlgmr.msra.gmra.mxu0 %vm47_vm1, %v1667_v17  ;;  %1584 = vmatmul.mubr.msk.f32.vlgmr.msra.gmra.mxu1 %vm47_vm1, %v1667_v17 }
  0x51   :  { %1587 = vset.pattern.permute.xlu0 %v1589_v6 }
  0x52   :  { %1410 = vperm.xlu0 %1587, %v1407_v5  }
  0xca   :  { %v142_v7 = vpop.f32.mrf.mxu0  ;;  %v213_v8 = vpop.f32.mrf.mxu1 }
  0xcc   :  { %v144_v9 = vpop.f32.mrf.mxu0  ;;  %v215_v10 = vpop.f32.mrf.mxu1 }
  0xcd   :  { %v1411_v36 = vpop.permute.xlu0 %1410 }
  0xd4   :  { %v284_v11 = vpop.f32.mrf.mxu0  ;;  %v355_v12 = vpop.f32.mrf.mxu1 }
  0xd6   :  { %v286_v3 = vpop.f32.mrf.mxu0  ;;  %v357_v13 = vpop.f32.mrf.mxu1 }
  0xde   :  { %v483_v14 = vpop.f32.mrf.mxu0  ;;  %v554_v15 = vpop.f32.mrf.mxu1 }
  0xdf   :  { %v701_v28 = vmax.f32 %v142_v7, %v483_v14  ;;  %v703_v29 = vmax.f32 %v213_v8, %v554_v15 }
  0xe0   :  { %v485_v16 = vpop.f32.mrf.mxu0  ;;  %v556_v18 = vpop.f32.mrf.mxu1 }
  0xe1   :  { %v702_v32 = vmax.f32 %v144_v9, %v485_v16  ;;  %v704_v33 = vmax.f32 %v215_v10, %v556_v18 }
  0xe8   :  { %v625_v19 = vpop.f32.mrf.mxu0  ;;  %v696_v20 = vpop.f32.mrf.mxu1 }
  0xe9   :  { %v705_v53 = vmax.f32 %v284_v11, %v625_v19  ;;  %v707_v54 = vmax.f32 %v355_v12, %v696_v20 }
  0xea   :  { %v627_v21 = vpop.f32.mrf.mxu0  ;;  %v698_v22 = vpop.f32.mrf.mxu1 }
  0xeb   :  { %v706_v57 = vmax.f32 %v286_v3, %v627_v21  ;;  %v708_v58 = vmax.f32 %v357_v13, %v698_v22 }
  0xf2   :  { %v832_v17 = vpop.f32.mrf.mxu0  ;;  %v903_v23 = vpop.f32.mrf.mxu1 }
  0xf3   :  { %v1050_v34 = vmax.f32 %v701_v28, %v832_v17  ;;  %v1052_v35 = vmax.f32 %v703_v29, %v903_v23 }
  0xf4   :  { %v834_v24 = vpop.f32.mrf.mxu0  ;;  %v905_v25 = vpop.f32.mrf.mxu1 }
  0xf5   :  { %v1051_v39 = vmax.f32 %v702_v32, %v834_v24  ;;  %v1053_v40 = vmax.f32 %v704_v33, %v905_v25 }
  0xfc   :  { %v974_v26 = vpop.f32.mrf.mxu0  ;;  %v1045_v27 = vpop.f32.mrf.mxu1 }
  0xfd   :  { %v1054_v59 = vmax.f32 %v705_v53, %v974_v26  ;;  %v1056_v60 = vmax.f32 %v707_v54, %v1045_v27 }
  0xfe   :  { %v976_v30 = vpop.f32.mrf.mxu0  ;;  %v1047_v31 = vpop.f32.mrf.mxu1 }
  0xff   :  { %v1055_v63 = vmax.f32 %v706_v57, %v976_v30  ;;  %v1057_v0 = vmax.f32 %v708_v58, %v1047_v31 }
 0x106   :  { %v1181_v37 = vpop.f32.mrf.mxu0  ;;  %v1252_v38 = vpop.f32.mrf.mxu1 }
 0x107   :  { %v1399_v41 = vmax.f32 %v1050_v34, %v1181_v37  ;;  %v1401_v42 = vmax.f32 %v1052_v35, %v1252_v38 }
 0x108   :  { %v1183_v43 = vpop.f32.mrf.mxu0  ;;  %v1254_v44 = vpop.f32.mrf.mxu1 }
 0x109   :  { %v1413_v45 = vadd.f32 %v1411_v36, %v1399_v41  ;;  %v1415_v46 = vadd.f32 %v1411_v36, %v1401_v42  ;;  %v1400_v47 = vmax.f32 %v1051_v39, %v1183_v43  ;;  %v1402_v48 = vmax.f32 %v1053_v40, %v1254_v44 }
 0x10b   :  { %v1421_v49 = vmax.f32 %v1413_v45, 0.0  ;;  %v1423_v50 = vmax.f32 %v1415_v46, 0.0  ;;  %v1414_v51 = vadd.f32 %v1411_v36, %v1400_v47  ;;  %v1416_v52 = vadd.f32 %v1411_v36, %v1402_v48 }
 0x10d   :  { %1429 = vst [vmem:[%s2109_s3] sm:$0x3f] %v1421_v49  ;;  %1431 = vst [vmem:[%s2109_s3 + $0x10] sm:$0x3f] %v1423_v50  ;;  %v1422_v55 = vmax.f32 %v1414_v51, 0.0  ;;  %v1424_v56 = vmax.f32 %v1416_v52, 0.0 }
 0x10f   :  { %1430 = vst [vmem:[%s2109_s3 + $0x8] sm:$0x3f] %v1422_v55  ;;  %1432 = vst [vmem:[%s2109_s3 + $0x18] sm:$0x3f] %v1424_v56 }
 0x110   :  { %v1323_v61 = vpop.f32.mrf.mxu0  ;;  %v1394_v62 = vpop.f32.mrf.mxu1 }
 0x111   :  { %v1403_v1 = vmax.f32 %v1054_v59, %v1323_v61  ;;  %v1405_v2 = vmax.f32 %v1056_v60, %v1394_v62 }
 0x112   :  { %v1325_v4 = vpop.f32.mrf.mxu0  ;;  %v1396_v5 = vpop.f32.mrf.mxu1 }
 0x113   :  { %v1417_v6 = vadd.f32 %v1411_v36, %v1403_v1  ;;  %v1419_v7 = vadd.f32 %v1411_v36, %v1405_v2  ;;  %v1404_v8 = vmax.f32 %v1055_v63, %v1325_v4  ;;  %v1406_v9 = vmax.f32 %v1057_v0, %v1396_v5 }
 0x115   :  { %v1425_v10 = vmax.f32 %v1417_v6, 0.0  ;;  %v1427_v11 = vmax.f32 %v1419_v7, 0.0  ;;  %v1418_v12 = vadd.f32 %v1411_v36, %v1404_v8  ;;  %v1420_v3 = vadd.f32 %v1411_v36, %v1406_v9 }
 0x117   :  { %1433 = vst [vmem:[%s2109_s3 + $0x20] sm:$0x3f] %v1425_v10  ;;  %1435 = vst [vmem:[%s2109_s3 + $0x30] sm:$0x3f] %v1427_v11  ;;  %v1426_v13 = vmax.f32 %v1418_v12, 0.0  ;;  %v1428_v14 = vmax.f32 %v1420_v3, 0.0 }
 0x119   :  { %1434 = vst [vmem:[%s2109_s3 + $0x28] sm:$0x3f] %v1426_v13  ;;  %1436 = vst [vmem:[%s2109_s3 + $0x38] sm:$0x3f] %v1428_v14 }

// kernel: net_forward.5
= control target key start
LH: loop header
LB: loop body
LE: loop exit
PB: predicated region body
PF: predicated region fallthrough
CT: control target
= control target key end

     0   :  { %vm33_vm0 = vcmask 1045504   ;;  %v466_v3 = vmov 0.0   ;;  %vm29_vm1 = vcmask 441344   ;;  %v467_v59 = vmov 0   ;;  %s690_s0 = inlined_call_operand.vmem [shape: f32[4,54,256], index: 0, kind: input, shape index: {}]   ;;  %s691_s1 = inlined_call_operand.vmem [shape: f32[6,54], index: 1, kind: input, shape index: {}]   ;;  %s692_s2 = inlined_call_operand.vmem [shape: f32[6,1], index: 2, kind: input, shape index: {}]   ;;  %s693_s3 = inlined_call_operand.vmem [shape: f32[6,256], index: 3, kind: output, shape index: {}]  }
   0x1   :  { %v28_v0 = vld [vmem:[%s690_s0 + $0x68] sm:$0x3f]  ;;  %v425_v1 = vld [vmem:[%s690_s0 + $0xd8] sm:$0x3f]  ;;  %v27_v2 = vld [vmem:[%s690_s0 + $0x60] sm:$0x3f]  ;;  %104 = vmatprep.mubr.f32.mxu0 %v466_v3  ;;  %196 = vmatprep.mubr.f32.mxu1 %v466_v3 }
   0x2   :  { %409 = vmatprep.subr.msk.mxu0 %vm33_vm0, %v28_v0  ;;  %426 = vmatprep.subr.msk.mxu1 %vm33_vm0, %v425_v1  ;;  %v424_v4 = vld [vmem:[%s690_s0 + $0xd0] sm:$0x3f]  ;;  %v26_v5 = vld [vmem:[%s690_s0 + $0x58] sm:$0xff]  ;;  %v423_v6 = vld [vmem:[%s690_s0 + $0xc8] sm:$0xff] }
   0x3   :  { %410 = vmatpush1.msk.msra.mxu0 %vm33_vm0, %v27_v2  ;;  %427 = vmatpush1.msk.msra.mxu1 %vm33_vm0, %v424_v4  ;;  %v25_v7 = vld [vmem:[%s690_s0 + $0x50] sm:$0xff]  ;;  %v422_v8 = vld [vmem:[%s690_s0 + $0xc0] sm:$0xff]  ;;  %v24_v9 = vld [vmem:[%s690_s0 + $0x48] sm:$0xff] }
   0x4   :  { %60 = vmatprep.subr.mxu0 %v26_v5  ;;  %152 = vmatprep.subr.mxu1 %v423_v6  ;;  %v421_v10 = vld [vmem:[%s690_s0 + $0xb8] sm:$0xff]  ;;  %v23_v11 = vld [vmem:[%s690_s0 + $0x40] sm:$0xff]  ;;  %v420_v12 = vld [vmem:[%s690_s0 + $0xb0] sm:$0xff] }
   0x5   :  { %61 = vmatpush1.msra.mxu0 %v25_v7  ;;  %153 = vmatpush1.msra.mxu1 %v422_v8  ;;  %v22_v13 = vld [vmem:[%s690_s0 + $0x38] sm:$0xff]  ;;  %v419_v14 = vld [vmem:[%s690_s0 + $0xa8] sm:$0xff]  ;;  %v21_v15 = vld [vmem:[%s690_s0 + $0x30] sm:$0xff] }
   0x6   :  { %62 = vmatprep.subr.mxu0 %v24_v9  ;;  %154 = vmatprep.subr.mxu1 %v421_v10  ;;  %v418_v16 = vld [vmem:[%s690_s0 + $0xa0] sm:$0xff]  ;;  %v20_v17 = vld [vmem:[%s690_s0 + $0x28] sm:$0xff]  ;;  %v417_v18 = vld [vmem:[%s690_s0 + $0x98] sm:$0xff] }
   0x7   :  { %63 = vmatpush1.msra.mxu0 %v23_v11  ;;  %155 = vmatpush1.msra.mxu1 %v420_v12  ;;  %v19_v19 = vld [vmem:[%s690_s0 + $0x20] sm:$0xff]  ;;  %v416_v20 = vld [vmem:[%s690_s0 + $0x90] sm:$0xff]  ;;  %v18_v21 = vld [vmem:[%s690_s0 + $0x18] sm:$0xff] }
   0x8   :  { %64 = vmatprep.subr.mxu0 %v22_v13  ;;  %156 = vmatprep.subr.mxu1 %v419_v14  ;;  %v415_v22 = vld [vmem:[%s690_s0 + $0x88] sm:$0xff]  ;;  %v17_v23 = vld [vmem:[%s690_s0 + $0x10] sm:$0xff]  ;;  %v414_v24 = vld [vmem:[%s690_s0 + $0x80] sm:$0xff] }
   0x9   :  { %65 = vmatpush1.msra.mxu0 %v21_v15  ;;  %157 = vmatpush1.msra.mxu1 %v418_v16  ;;  %v16_v25 = vld [vmem:[%s690_s0 + $0x8] sm:$0xff]  ;;  %v413_v26 = vld [vmem:[%s690_s0 + $0x78] sm:$0xff]  ;;  %v15_v27 = vld [vmem:[%s690_s0] sm:$0xff] }
   0xa   :  { %66 = vmatprep.subr.mxu0 %v20_v17  ;;  %158 = vmatprep.subr.mxu1 %v417_v18  ;;  %v412_v28 = vld [vmem:[%s690_s0 + $0x70] sm:$0xff]  ;;  %v581_v29 = vld [vmem:[%s691_s1] sm:$0x3f]  ;;  %v442_v30 = vld [vmem:[%s690_s0 + $0x148] sm:$0x3f] }
   0xb   :  { %67 = vmatpush1.msra.mxu0 %v19_v19  ;;  %159 = vmatpush1.msra.mxu1 %v416_v20  ;;  %v459_v31 = vld [vmem:[%s690_s0 + $0x1b8] sm:$0x3f]  ;;  %v441_v32 = vld [vmem:[%s690_s0 + $0x140] sm:$0x3f]  ;;  %v458_v33 = vld [vmem:[%s690_s0 + $0x1b0] sm:$0x3f] }
   0xc   :  { %68 = vmatprep.subr.mxu0 %v18_v21  ;;  %160 = vmatprep.subr.mxu1 %v415_v22  ;;  %v440_v34 = vld [vmem:[%s690_s0 + $0x138] sm:$0xff]  ;;  %v457_v35 = vld [vmem:[%s690_s0 + $0x1a8] sm:$0xff]  ;;  %v439_v36 = vld [vmem:[%s690_s0 + $0x130] sm:$0xff] }
   0xd   :  { %69 = vmatpush1.msra.mxu0 %v17_v23  ;;  %161 = vmatpush1.msra.mxu1 %v414_v24  ;;  %v456_v37 = vld [vmem:[%s690_s0 + $0x1a0] sm:$0xff]  ;;  %v438_v38 = vld [vmem:[%s690_s0 + $0x128] sm:$0xff]  ;;  %v455_v39 = vld [vmem:[%s690_s0 + $0x198] sm:$0xff] }
   0xe   :  { %70 = vmatprep.subr.mxu0 %v16_v25  ;;  %162 = vmatprep.subr.mxu1 %v413_v26  ;;  %v437_v40 = vld [vmem:[%s690_s0 + $0x120] sm:$0xff]  ;;  %v454_v41 = vld [vmem:[%s690_s0 + $0x190] sm:$0xff]  ;;  %v436_v42 = vld [vmem:[%s690_s0 + $0x118] sm:$0xff] }
   0xf   :  { %71 = vmatpush1.msra.mxu0 %v15_v27  ;;  %163 = vmatpush1.msra.mxu1 %v412_v28  ;;  %v453_v43 = vld [vmem:[%s690_s0 + $0x188] sm:$0xff]  ;;  %v435_v44 = vld [vmem:[%s690_s0 + $0x110] sm:$0xff]  ;;  %v452_v45 = vld [vmem:[%s690_s0 + $0x180] sm:$0xff] }
  0x10   :  { %411 = vmatmul.mubr.msk.f32.vlgmr.msra.gmra.mxu0 %vm29_vm1, %v581_v29  ;;  %428 = vmatmul.mubr.msk.f32.vlgmr.msra.gmra.mxu1 %vm29_vm1, %v581_v29  ;;  %v434_v46 = vld [vmem:[%s690_s0 + $0x108] sm:$0xff]  ;;  %v451_v47 = vld [vmem:[%s690_s0 + $0x178] sm:$0xff]  ;;  %v433_v48 = vld [vmem:[%s690_s0 + $0x100] sm:$0xff] }
  0x11   :  { %443 = vmatprep.subr.msk.mxu0 %vm33_vm0, %v442_v30  ;;  %460 = vmatprep.subr.msk.mxu1 %vm33_vm0, %v459_v31  ;;  %v450_v49 = vld [vmem:[%s690_s0 + $0x170] sm:$0xff]  ;;  %v432_v50 = vld [vmem:[%s690_s0 + $0xf8] sm:$0xff]  ;;  %v449_v51 = vld [vmem:[%s690_s0 + $0x168] sm:$0xff] }
  0x12   :  { %444 = vmatpush1.msk.msra.mxu0 %vm33_vm0, %v441_v32  ;;  %461 = vmatpush1.msk.msra.mxu1 %vm33_vm0, %v458_v33  ;;  %v431_v52 = vld [vmem:[%s690_s0 + $0xf0] sm:$0xff]  ;;  %v448_v53 = vld [vmem:[%s690_s0 + $0x160] sm:$0xff]  ;;  %v430_v54 = vld [vmem:[%s690_s0 + $0xe8] sm:$0xff] }
  0x13   :  { %246 = vmatprep.subr.mxu0 %v440_v34  ;;  %340 = vmatprep.subr.mxu1 %v457_v35  ;;  %v447_v55 = vld [vmem:[%s690_s0 + $0x158] sm:$0xff]  ;;  %v429_v56 = vld [vmem:[%s690_s0 + $0xe0] sm:$0xff]  ;;  %v446_v57 = vld [vmem:[%s690_s0 + $0x150] sm:$0xff] }
  0x14   :  { %247 = vmatpush1.msra.mxu0 %v439_v36  ;;  %341 = vmatpush1.msra.mxu1 %v456_v37  ;;  %v393_v58 = vld [vmem:[%s692_s2] sm:$0x3f] }
  0x15   :  { %248 = vmatprep.subr.mxu0 %v438_v38  ;;  %342 = vmatprep.subr.mxu1 %v455_v39 }
  0x16   :  { %249 = vmatpush1.msra.mxu0 %v437_v40  ;;  %343 = vmatpush1.msra.mxu1 %v454_v41 }
  0x17   :  { %250 = vmatprep.subr.mxu0 %v436_v42  ;;  %344 = vmatprep.subr.mxu1 %v453_v43 }
  0x18   :  { %251 = vmatpush1.msra.mxu0 %v435_v44  ;;  %345 = vmatpush1.msra.mxu1 %v452_v45 }
  0x19   :  { %252 = vmatprep.subr.mxu0 %v434_v46  ;;  %346 = vmatprep.subr.mxu1 %v451_v47 }
  0x1a   :  { %253 = vmatpush1.msra.mxu0 %v433_v48  ;;  %347 = vmatpush1.msra.mxu1 %v450_v49 }
  0x1b   :  { %254 = vmatprep.subr.mxu0 %v432_v50  ;;  %348 = vmatprep.subr.mxu1 %v449_v51 }
  0x1c   :  { %255 = vmatpush1.msra.mxu0 %v431_v52  ;;  %349 = vmatpush1.msra.mxu1 %v448_v53 }
  0x1d   :  { %256 = vmatprep.subr.mxu0 %v430_v54  ;;  %350 = vmatprep.subr.mxu1 %v447_v55 }
  0x1e   :  { %257 = vmatpush1.msra.mxu0 %v429_v56  ;;  %290 = vmatprep.mubr.f32.mxu0 %v466_v3 }
  0x1f   :  { %351 = vmatpush1.msra.mxu1 %v446_v57  ;;  %384 = vmatprep.mubr.f32.mxu1 %v466_v3 }
  0x20   :  { %445 = vmatmul.mubr.msk.f32.vlgmr.msra.gmra.mxu0 %vm29_vm1, %v581_v29  ;;  %462 = vmatmul.mubr.msk.f32.vlgmr.msra.gmra.mxu1 %vm29_vm1, %v581_v29 }
  0x21   :  { %465 = vset.pattern.permute.xlu0 %v467_v59 }
  0x22   :  { %396 = vperm.xlu0 %465, %v393_v58  }
  0x9d   :  { %v397_v6 = vpop.permute.xlu0 %396 }
  0xd0   :  { %v106_v60 = vpop.f32.mrf.mxu0  ;;  %v198_v61 = vpop.f32.mrf.mxu1 }
  0xd1   :  { %v203_v0 = vmax.f32 %v106_v60, %v198_v61 }
  0xd2   :  { %v108_v62 = vpop.f32.mrf.mxu0  ;;  %v200_v63 = vpop.f32.mrf.mxu1 }
  0xd3   :  { %v204_v3 = vmax.f32 %v108_v62, %v200_v63 }
  0xe0   :  { %v292_v1 = vpop.f32.mrf.mxu0  ;;  %v386_v2 = vpop.f32.mrf.mxu1 }
  0xe1   :  { %v297_v4 = vmax.f32 %v203_v0, %v292_v1 }
  0xe2   :  { %v294_v5 = vpop.f32.mrf.mxu0  ;;  %v388_v9 = vpop.f32.mrf.mxu1 }
  0xe3   :  { %v391_v7 = vmax.f32 %v297_v4, %v386_v2  ;;  %v298_v8 = vmax.f32 %v204_v3, %v294_v5 }
  0xe5   :  { %v392_v10 = vmax.f32 %v298_v8, %v388_v9  ;;  %v399_v11 = vadd.f32 %v397_v6, %v391_v7 }
  0xe7   :  { %v400_v12 = vadd.f32 %v397_v6, %v392_v10  ;;  %v401_v13 = vmax.f32 %v399_v11, 0.0 }
  0xe9   :  { %v402_v14 = vmax.f32 %v400_v12, 0.0  ;;  %403 = vst [vmem:[%s693_s3] sm:$0x3f] %v401_v13 }
  0xeb   :  { %404 = vst [vmem:[%s693_s3 + $0x8] sm:$0x3f] %v402_v14 }

// kernel: net_forward.6
= control target key start
LH: loop header
LB: loop body
LE: loop exit
PB: predicated region body
PF: predicated region fallthrough
CT: control target
= control target key end

     0   :  { %vm30_vm0 = vcmask 1045504   ;;  %v534_v3 = vmov 0   ;;  %vm23_vm1 = vcmask 441344   ;;  %s673_s0 = inlined_call_operand.vmem [shape: f32[4,54,128], index: 0, kind: input, shape index: {}]   ;;  %s674_s1 = inlined_call_operand.vmem [shape: f32[16,54], index: 1, kind: input, shape index: {}]   ;;  %s675_s2 = inlined_call_operand.vmem [shape: f32[16,1], index: 2, kind: input, shape index: {}]   ;;  %s676_s3 = inlined_call_operand.vmem [shape: f32[16,128], index: 3, kind: output, shape index: {}]  }
   0x1   :  { %v22_v0 = vld [vmem:[%s673_s0 + $0x30] sm:$0x3f]  ;;  %v404_v1 = vld [vmem:[%s673_s0 + $0x68] sm:$0x3f]  ;;  %533 = vset.pattern.permute.xlu0 %v534_v3  ;;  %v403_v4 = vld [vmem:[%s673_s0 + $0x60] sm:$0xff] }
   0x2   :  { %v21_v2 = vld [vmem:[%s673_s0 + $0x28] sm:$0xff]  ;;  %464 = vmatprep.subr.msk.mxu0 %vm30_vm0, %v22_v0  ;;  %481 = vmatprep.subr.msk.mxu1 %vm30_vm0, %v404_v1  ;;  %v20_v5 = vld [vmem:[%s673_s0 + $0x20] sm:$0xff]  ;;  %v402_v6 = vld [vmem:[%s673_s0 + $0x58] sm:$0xff] }
   0x3   :  { %465 = vmatpush3.msk.msra.mxu0 %vm30_vm0, %v22_v0  ;;  %482 = vmatpush3.msk.msra.mxu1 %vm30_vm0, %v404_v1  ;;  %v19_v7 = vld [vmem:[%s673_s0 + $0x18] sm:$0xff]  ;;  %v401_v8 = vld [vmem:[%s673_s0 + $0x50] sm:$0xff]  ;;  %v400_v10 = vld [vmem:[%s673_s0 + $0x48] sm:$0xff] }
   0x4   :  { %466 = vmatprep.subr.mxu0 %v21_v2  ;;  %483 = vmatprep.subr.mxu1 %v403_v4  ;;  %v18_v9 = vld [vmem:[%s673_s0 + $0x10] sm:$0xff]  ;;  %v17_v11 = vld [vmem:[%s673_s0 + $0x8] sm:$0xff]  ;;  %v399_v12 = vld [vmem:[%s673_s0 + $0x40] sm:$0xff] }
   0x5   :  { %467 = vmatpush3.msra.mxu0 %v21_v2  ;;  %484 = vmatpush3.msra.mxu1 %v403_v4  ;;  %v16_v13 = vld [vmem:[%s673_s0] sm:$0xff]  ;;  %v398_v14 = vld [vmem:[%s673_s0 + $0x38] sm:$0xff]  ;;  %v15_v16 = vld [vmem:[%s674_s1 + $0x8] sm:$0xff] }
   0x6   :  { %468 = vmatprep.subr.mxu0 %v20_v5  ;;  %485 = vmatprep.subr.mxu1 %v402_v6  ;;  %v14_v15 = vld [vmem:[%s674_s1] sm:$0xff]  ;;  %v424_v18 = vld [vmem:[%s673_s0 + $0xd8] sm:$0x3f]  ;;  %v423_v20 = vld [vmem:[%s673_s0 + $0xd0] sm:$0xff] }
   0x7   :  { %469 = vmatpush3.msra.mxu0 %v20_v5  ;;  %486 = vmatpush3.msra.mxu1 %v402_v6  ;;  %v414_v17 = vld [vmem:[%s673_s0 + $0xa0] sm:$0x3f]  ;;  %v413_v19 = vld [vmem:[%s673_s0 + $0x98] sm:$0xff]  ;;  %v412_v21 = vld [vmem:[%s673_s0 + $0x90] sm:$0xff] }
   0x8   :  { %470 = vmatprep.subr.mxu0 %v19_v7  ;;  %487 = vmatprep.subr.mxu1 %v401_v8  ;;  %v422_v22 = vld [vmem:[%s673_s0 + $0xc8] sm:$0xff]  ;;  %v421_v24 = vld [vmem:[%s673_s0 + $0xc0] sm:$0xff]  ;;  %v420_v26 = vld [vmem:[%s673_s0 + $0xb8] sm:$0xff] }
   0x9   :  { %471 = vmatpush3.msra.mxu0 %v19_v7  ;;  %488 = vmatpush3.msra.mxu1 %v401_v8  ;;  %v411_v23 = vld [vmem:[%s673_s0 + $0x88] sm:$0xff]  ;;  %v410_v25 = vld [vmem:[%s673_s0 + $0x80] sm:$0xff]  ;;  %v409_v27 = vld [vmem:[%s673_s0 + $0x78] sm:$0xff] }
   0xa   :  { %472 = vmatprep.subr.mxu0 %v18_v9  ;;  %489 = vmatprep.subr.mxu1 %v400_v10  ;;  %v419_v28 = vld [vmem:[%s673_s0 + $0xb0] sm:$0xff]  ;;  %v418_v30 = vld [vmem:[%s673_s0 + $0xa8] sm:$0xff]  ;;  %v373_v31 = vld [vmem:[%s675_s2] sm:$0xff] }
   0xb   :  { %473 = vmatpush3.msra.mxu0 %v18_v9  ;;  %490 = vmatpush3.msra.mxu1 %v400_v10  ;;  %v408_v29 = vld [vmem:[%s673_s0 + $0x70] sm:$0xff]  ;;  %v374_v32 = vld [vmem:[%s675_s2 + $0x8] sm:$0xff] }
   0xc   :  { %474 = vmatprep.subr.mxu0 %v17_v11  ;;  %491 = vmatprep.subr.mxu1 %v399_v12 }
   0xd   :  { %475 = vmatpush3.msra.mxu0 %v17_v11  ;;  %492 = vmatpush3.msra.mxu1 %v399_v12 }
   0xe   :  { %476 = vmatprep.subr.mxu0 %v16_v13  ;;  %493 = vmatprep.subr.mxu1 %v398_v14 }
   0xf   :  { %477 = vmatpush3.msra.mxu0 %v16_v13  ;;  %478 = vmatprep.mubr.msk.f32.mxu0 %vm23_vm1, %v14_v15 }
  0x10   :  { %494 = vmatpush3.msra.mxu1 %v398_v14  ;;  %495 = vmatprep.mubr.msk.f32.mxu1 %vm23_vm1, %v14_v15 }
  0x11   :  { %479 = vmatmul.mubr.msk.f32.vlgmr.msra.gmra.mxu0 %vm23_vm1, %v15_v16  ;;  %496 = vmatmul.mubr.msk.f32.vlgmr.msra.gmra.mxu1 %vm23_vm1, %v15_v16 }
  0x12   :  { %498 = vmatprep.subr.msk.mxu0 %vm30_vm0, %v414_v17  ;;  %515 = vmatprep.subr.msk.mxu1 %vm30_vm0, %v424_v18 }
  0x13   :  { %499 = vmatpush3.msk.msra.mxu0 %vm30_vm0, %v414_v17  ;;  %516 = vmatpush3.msk.msra.mxu1 %vm30_vm0, %v424_v18 }
  0x14   :  { %500 = vmatprep.subr.mxu0 %v413_v19  ;;  %517 = vmatprep.subr.mxu1 %v423_v20 }
  0x15   :  { %501 = vmatpush3.msra.mxu0 %v413_v19  ;;  %518 = vmatpush3.msra.mxu1 %v423_v20 }
  0x16   :  { %502 = vmatprep.subr.mxu0 %v412_v21  ;;  %519 = vmatprep.subr.mxu1 %v422_v22 }
  0x17   :  { %503 = vmatpush3.msra.mxu0 %v412_v21  ;;  %520 = vmatpush3.msra.mxu1 %v422_v22 }
  0x18   :  { %504 = vmatprep.subr.mxu0 %v411_v23  ;;  %521 = vmatprep.subr.mxu1 %v421_v24 }
  0x19   :  { %505 = vmatpush3.msra.mxu0 %v411_v23  ;;  %522 = vmatpush3.msra.mxu1 %v421_v24 }
  0x1a   :  { %506 = vmatprep.subr.mxu0 %v410_v25  ;;  %523 = vmatprep.subr.mxu1 %v420_v26 }
  0x1b   :  { %507 = vmatpush3.msra.mxu0 %v410_v25  ;;  %524 = vmatpush3.msra.mxu1 %v420_v26 }
  0x1c   :  { %508 = vmatprep.subr.mxu0 %v409_v27  ;;  %525 = vmatprep.subr.mxu1 %v419_v28 }
  0x1d   :  { %509 = vmatpush3.msra.mxu0 %v409_v27  ;;  %526 = vmatpush3.msra.mxu1 %v419_v28 }
  0x1e   :  { %510 = vmatprep.subr.mxu0 %v408_v29  ;;  %527 = vmatprep.subr.mxu1 %v418_v30 }
  0x1f   :  { %511 = vmatpush3.msra.mxu0 %v408_v29  ;;  %512 = vmatprep.mubr.msk.f32.mxu0 %vm23_vm1, %v14_v15 }
  0x20   :  { %528 = vmatpush3.msra.mxu1 %v418_v30  ;;  %529 = vmatprep.mubr.msk.f32.mxu1 %vm23_vm1, %v14_v15 }
  0x21   :  { %513 = vmatmul.mubr.msk.f32.vlgmr.msra.gmra.mxu0 %vm23_vm1, %v15_v16  ;;  %530 = vmatmul.mubr.msk.f32.vlgmr.msra.gmra.mxu1 %vm23_vm1, %v15_v16 }
  0x22   :  { %377 = vperm.xlu0 %533, %v373_v31  }
  0x26   :  { %382 = vperm.xlu0 %533, %v374_v32  }
  0x9d   :  { %v378_v35 = vpop.permute.xlu0 %377 }
  0xa1   :  { %v383_v46 = vpop.permute.xlu0 %382 }
  0xd1   :  { %v480_v33 = vpop.f32.mrf.mxu0  ;;  %v497_v34 = vpop.f32.mrf.mxu1 }
  0xd2   :  { %v196_v38 = vmax.f32 %v480_v33, %v497_v34 }
  0xd3   :  { %v100_v36 = vpop.f32.mrf.mxu0  ;;  %v186_v37 = vpop.f32.mrf.mxu1 }
  0xd4   :  { %v195_v41 = vmax.f32 %v100_v36, %v186_v37 }
  0xe1   :  { %v514_v39 = vpop.f32.mrf.mxu0  ;;  %v531_v40 = vpop.f32.mrf.mxu1 }
  0xe2   :  { %v284_v42 = vmax.f32 %v196_v38, %v514_v39 }
  0xe3   :  { %v274_v43 = vpop.f32.mrf.mxu0  ;;  %v362_v47 = vpop.f32.mrf.mxu1 }
  0xe4   :  { %v372_v44 = vmax.f32 %v284_v42, %v531_v40  ;;  %v283_v45 = vmax.f32 %v195_v41, %v274_v43 }
  0xe6   :  { %v386_v48 = vadd.f32 %v383_v46, %v372_v44  ;;  %v371_v49 = vmax.f32 %v283_v45, %v362_v47 }
  0xe8   :  { %v388_v50 = vmax.f32 %v386_v48, 0.0  ;;  %v385_v51 = vadd.f32 %v378_v35, %v371_v49 }
  0xea   :  { %390 = vst [vmem:[%s676_s3 + $0x8] sm:$0xff] %v388_v50  ;;  %v387_v52 = vmax.f32 %v385_v51, 0.0 }
  0xec   :  { %389 = vst [vmem:[%s676_s3] sm:$0xff] %v387_v52 }

// kernel: net_forward.7
= control target key start
LH: loop header
LB: loop body
LE: loop exit
PB: predicated region body
PF: predicated region fallthrough
CT: control target
= control target key end

     0   :  { %v486_v4 = vmov 0.0   ;;  %s731_s0 = inlined_call_operand.vmem [shape: f32[2,256], index: 0, kind: input, shape index: {}]   ;;  %s732_s1 = inlined_call_operand.vmem [shape: f32[256,120], index: 1, kind: input, shape index: {}]   ;;  %s733_s2 = inlined_call_operand.vmem [shape: f32[1,120], index: 2, kind: input, shape index: {}]   ;;  %s734_s3 = inlined_call_operand.vmem [shape: f32[120,48], index: 3, kind: input, shape index: {}]   ;;  %s735_s4 = inlined_call_operand.vmem [shape: f32[1,48], index: 4, kind: input, shape index: {}]   ;;  %s736_s5 = inlined_call_operand.vmem [shape: f32[48,3], index: 5, kind: input, shape index: {}]   ;;  %s737_s6 = inlined_call_operand.vmem [shape: f32[1,3], index: 6, kind: input, shape index: {}]   ;;  %s738_s7 = inlined_call_operand.hbm [shape: f32[2,3], index: 7, kind: output, shape index: {}]  }
   0x1   :  { %v59_v0 = vld [vmem:[%s732_s1 + $0xf8] sm:$0xff]  ;;  %v58_v2 = vld [vmem:[%s732_s1 + $0xf0] sm:$0xff]  ;;  %413 = vmatprep.subr.mxu1 %v486_v4  ;;  %v57_v5 = vld [vmem:[%s732_s1 + $0xe8] sm:$0xff] }
   0x2   :  { %v43_v1 = vld [vmem:[%s732_s1 + $0x78] sm:$0xff]  ;;  %355 = vmatprep.subr.mxu0 %v59_v0  ;;  %v42_v3 = vld [vmem:[%s732_s1 + $0x70] sm:$0xff]  ;;  %v41_v6 = vld [vmem:[%s732_s1 + $0x68] sm:$0xff] }
   0x3   :  { %356 = vmatpush3.msra.mxu0 %v43_v1  ;;  %v56_v7 = vld [vmem:[%s732_s1 + $0xe0] sm:$0xff]  ;;  %v55_v9 = vld [vmem:[%s732_s1 + $0xd8] sm:$0xff]  ;;  %v54_v11 = vld [vmem:[%s732_s1 + $0xd0] sm:$0xff] }
   0x4   :  { %357 = vmatprep.subr.mxu0 %v58_v2  ;;  %v40_v8 = vld [vmem:[%s732_s1 + $0x60] sm:$0xff]  ;;  %v39_v10 = vld [vmem:[%s732_s1 + $0x58] sm:$0xff]  ;;  %v38_v12 = vld [vmem:[%s732_s1 + $0x50] sm:$0xff] }
   0x5   :  { %358 = vmatpush3.msra.mxu0 %v42_v3  ;;  %v53_v13 = vld [vmem:[%s732_s1 + $0xc8] sm:$0xff]  ;;  %v572_v14 = vld.sshfl [vmem:[%s731_s0] sm:$0x33 pattern:$0x76325410]  ;;  %v163_v17 = vld [vmem:[%s734_s3 + $0x70] sm:$0xff] }
   0x6   :  { %359 = vmatprep.subr.mxu0 %v57_v5  ;;  %v37_v15 = vld [vmem:[%s732_s1 + $0x48] sm:$0xff]  ;;  %v75_v16 = vcombine.high %v572_v14, %v572_v14  ;;  %v52_v18 = vld [vmem:[%s732_s1 + $0xc0] sm:$0xff]  ;;  %414 = vmatpush3.msra.mxu1 %v163_v17  ;;  %v51_v21 = vld [vmem:[%s732_s1 + $0xb8] sm:$0xff] }
   0x7   :  { %360 = vmatpush3.msra.mxu0 %v41_v6  ;;  %v162_v19 = vld [vmem:[%s734_s3 + $0x68] sm:$0xff]  ;;  %v36_v20 = vld [vmem:[%s732_s1 + $0x40] sm:$0xff]  ;;  %415 = vmatprep.subr.mxu1 %v486_v4 }
   0x8   :  { %361 = vmatprep.subr.mxu0 %v56_v7  ;;  %142 = vmatprep.mubr.f32.mxu0 %v75_v16  ;;  %v161_v22 = vld [vmem:[%s734_s3 + $0x60] sm:$0xff] }
   0x9   :  { %362 = vmatpush3.msra.mxu0 %v40_v8 }
   0xa   :  { %363 = vmatprep.subr.mxu0 %v55_v9 }
   0xb   :  { %364 = vmatpush3.msra.mxu0 %v39_v10 }
   0xc   :  { %365 = vmatprep.subr.mxu0 %v54_v11 }
   0xd   :  { %366 = vmatpush3.msra.mxu0 %v38_v12 }
   0xe   :  { %367 = vmatprep.subr.mxu0 %v53_v13 }
   0xf   :  { %368 = vmatpush3.msra.mxu0 %v37_v15 }
  0x10   :  { %12 = vsyncpa [#allocation3], 0  ;;  %369 = vmatprep.subr.mxu0 %v52_v18  ;;  %v35_v23 = vld [vmem:[%s732_s1 + $0x38] sm:$0xff]  ;;  %416 = vmatpush3.msra.mxu1 %v162_v19  ;;  %v50_v24 = vld [vmem:[%s732_s1 + $0xb0] sm:$0xff]  ;;  %vm487_vm0 = vmmov 0   ;;  %vm171_vm1 = vcmask 982016  }
  0x11   :  { %370 = vmatpush3.msra.mxu0 %v36_v20  ;;  %417 = vmatprep.subr.mxu1 %v486_v4  ;;  %v160_v25 = vld [vmem:[%s734_s3 + $0x58] sm:$0xff]  ;;  %v34_v26 = vld [vmem:[%s732_s1 + $0x30] sm:$0xff]  ;;  %v49_v27 = vld [vmem:[%s732_s1 + $0xa8] sm:$0xff]  ;;  %vm259_vm2 = vcmask 392192   ;;  %s488_s16 = smov [#allocation2]   ;;  %vm333_vm3 = vcmask 17408  }
  0x12   :  { %371 = vmatprep.subr.mxu0 %v51_v21  ;;  %418 = vmatpush3.msra.mxu1 %v161_v22  ;;  %v159_v28 = vld [vmem:[%s734_s3 + $0x50] sm:$0xff]  ;;  %v33_v29 = vld [vmem:[%s732_s1 + $0x28] sm:$0xff]  ;;  %v48_v30 = vld [vmem:[%s732_s1 + $0xa0] sm:$0xff]  ;;  %s341_s17 = sshll.u32 %s488_s16, 4  ;;  %s342_s17 = int_to_ptr.vmem [resolvable:$true] %s341_s17 }
  0x13   :  { %372 = vmatpush3.msra.mxu0 %v35_v23  ;;  %419 = vmatprep.subr.mxu1 %v486_v4  ;;  %v158_v31 = vld [vmem:[%s734_s3 + $0x48] sm:$0xff]  ;;  %v32_v32 = vld [vmem:[%s732_s1 + $0x20] sm:$0xff]  ;;  %v47_v33 = vld [vmem:[%s732_s1 + $0x98] sm:$0xff]  ;;  %p469_p1 = scmp.lt.s32.totalorder %s342_s17, %s342_s17 }
  0x14   :  { %373 = vmatprep.subr.mxu0 %v50_v24  ;;  %420 = vmatpush3.msra.mxu1 %v160_v25  ;;  %v157_v34 = vld [vmem:[%s734_s3 + $0x40] sm:$0xff]  ;;  %v31_v35 = vld [vmem:[%s732_s1 + $0x18] sm:$0xff]  ;;  %v46_v36 = vld [vmem:[%s732_s1 + $0x90] sm:$0xff] }
  0x15   :  { %374 = vmatpush3.msra.mxu0 %v34_v26  ;;  %421 = vmatprep.subr.mxu1 %v486_v4  ;;  %v156_v37 = vld [vmem:[%s734_s3 + $0x38] sm:$0xff]  ;;  %v30_v38 = vld [vmem:[%s732_s1 + $0x10] sm:$0xff]  ;;  %v45_v39 = vld [vmem:[%s732_s1 + $0x88] sm:$0xff] }
  0x16   :  { %375 = vmatprep.subr.mxu0 %v49_v27  ;;  %422 = vmatpush3.msra.mxu1 %v159_v28  ;;  %v155_v40 = vld [vmem:[%s734_s3 + $0x30] sm:$0xff]  ;;  %v29_v41 = vld [vmem:[%s732_s1 + $0x8] sm:$0xff]  ;;  %v44_v42 = vld [vmem:[%s732_s1 + $0x80] sm:$0xff] }
  0x17   :  { %376 = vmatpush3.msra.mxu0 %v33_v29  ;;  %423 = vmatprep.subr.mxu1 %v486_v4  ;;  %v154_v43 = vld [vmem:[%s734_s3 + $0x28] sm:$0xff]  ;;  %v28_v44 = vld [vmem:[%s732_s1] sm:$0xff]  ;;  %v152_v46 = vld [vmem:[%s734_s3 + $0x18] sm:$0xff] }
  0x18   :  { %377 = vmatprep.subr.mxu0 %v48_v30  ;;  %424 = vmatpush3.msra.mxu1 %v158_v31  ;;  %v153_v45 = vld [vmem:[%s734_s3 + $0x20] sm:$0xff]  ;;  %v151_v47 = vld [vmem:[%s734_s3 + $0x10] sm:$0xff]  ;;  %v150_v48 = vld [vmem:[%s734_s3 + $0x8] sm:$0xff] }
  0x19   :  { %378 = vmatpush3.msra.mxu0 %v32_v32  ;;  %425 = vmatprep.subr.mxu1 %v486_v4  ;;  %v149_v49 = vld [vmem:[%s734_s3] sm:$0xff]  ;;  %v251_v56 = vld [vmem:[%s736_s5 + $0x28] sm:$0xff]  ;;  %v249_v58 = vld [vmem:[%s736_s5 + $0x18] sm:$0xff] }
  0x1a   :  { %379 = vmatprep.subr.mxu0 %v47_v33  ;;  %426 = vmatpush3.msra.mxu1 %v157_v34  ;;  %v349_v51 = vld [vmem:[%s733_s2] ss:$0 sm:$0xff]  ;;  %v248_v59 = vld [vmem:[%s736_s5 + $0x10] sm:$0xff]  ;;  %v247_v60 = vld [vmem:[%s736_s5 + $0x8] sm:$0xff] }
  0x1b   :  { %380 = vmatpush3.msra.mxu0 %v31_v35  ;;  %427 = vmatprep.subr.mxu1 %v486_v4  ;;  %v250_v57 = vld [vmem:[%s736_s5 + $0x20] sm:$0xff] }
  0x1c   :  { %381 = vmatprep.subr.mxu0 %v46_v36  ;;  %428 = vmatpush3.msra.mxu1 %v156_v37  ;;  %v246_v61 = vld [vmem:[%s736_s5] sm:$0xff]  ;;  %s464_s5 = scalar_lea.vmem %s342_s17, 32 }
  0x1d   :  { %382 = vmatpush3.msra.mxu0 %v30_v38  ;;  %429 = vmatprep.subr.mxu1 %v486_v4  ;;  %v351_v62 = vld [vmem:[%s735_s4] ss:$0 sm:$0xff]  ;;  %p465_p0 = scmp.ne.s32.totalorder %s342_s17, %s464_s5  ;;  %p470_p2 = scmp.lt.s32.totalorder %s464_s5, %s464_s5 }
  0x1e   :  { %383 = vmatprep.subr.mxu0 %v45_v39  ;;  %430 = vmatpush3.msra.mxu1 %v155_v40  ;;  %v353_v3 = vld [vmem:[%s737_s6] ss:$0 sm:$0xff] }
  0x1f   :  { %384 = vmatpush3.msra.mxu0 %v29_v41  ;;  %431 = vmatprep.subr.mxu1 %v486_v4  ;;  %p471_p3 = por %p470_p2, %p469_p1 }
  0x20   :  { %385 = vmatprep.subr.mxu0 %v44_v42  ;;  %432 = vmatpush3.msra.mxu1 %v154_v43 }
  0x21   :  { %386 = vmatpush3.msra.mxu0 %v28_v44  ;;  %433 = vmatprep.subr.mxu1 %v486_v4  ;;  %p472_p4 = pnand %p471_p3, %p465_p0 }
  0x22   :  { %143 = vmatmul.mubr.f32.vlgmr.msra.gmra.mxu0 %v572_v14  ;;  %434 = vmatpush3.msra.mxu1 %v153_v45 }
  0x23   :  { %435 = vmatprep.subr.mxu1 %v486_v4  ;;  %443 = vmatprep.mubr.msk.f32.mxu1 %vm487_vm0, %v486_v4 }
  0x24   :  { %436 = vmatpush3.msra.mxu1 %v152_v46 }
  0x25   :  { %437 = vmatprep.subr.mxu1 %v486_v4 }
  0x26   :  { %438 = vmatpush3.msra.mxu1 %v151_v47 }
  0x27   :  { %439 = vmatprep.subr.mxu1 %v486_v4 }
  0x28   :  { %440 = vmatpush3.msra.mxu1 %v150_v48 }
  0x29   :  { %441 = vmatprep.subr.mxu1 %v486_v4 }
  0x2a   :  { %442 = vmatpush3.msra.mxu1 %v149_v49 }
  0x2b   :  { %446 = vmatprep.subr.mxu1 %v486_v4 }
  0xe2   :  { %v387_v50 = vpop.f32.mrf.mxu0 }
  0xe4   :  { %v388_v52 = vpop.f32.mrf.mxu0 }
  0xe5   :  { %v389_v53 = vadd.f32 %v388_v52, %v387_v50 }
  0xe7   :  { %v145_v54 = vadd.f32 %v389_v53, %v349_v51 }
  0xe9   :  { %v148_v55 = vmax.f32 %v145_v54, 0.0 }
  0xeb   :  { %444 = vmatmul.mubr.msk.f32.vlgmr.msra.gmra.mxu1 %vm171_vm1, %v148_v55 }
  0xec   :  { %447 = vmatpush3.msra.mxu1 %v251_v56  ;;  %458 = vmatprep.mubr.msk.f32.mxu1 %vm487_vm0, %v486_v4 }
  0xed   :  { %448 = vmatprep.subr.mxu1 %v486_v4 }
  0xee   :  { %449 = vmatpush3.msra.mxu1 %v250_v57 }
  0xef   :  { %450 = vmatprep.subr.mxu1 %v486_v4 }
  0xf0   :  { %451 = vmatpush3.msra.mxu1 %v249_v58 }
  0xf1   :  { %452 = vmatprep.subr.mxu1 %v486_v4 }
  0xf2   :  { %453 = vmatpush3.msra.mxu1 %v248_v59 }
  0xf3   :  { %454 = vmatprep.subr.mxu1 %v486_v4 }
  0xf4   :  { %455 = vmatpush3.msra.mxu1 %v247_v60 }
  0xf5   :  { %456 = vmatprep.subr.mxu1 %v486_v4 }
  0xf6   :  { %457 = vmatpush3.msra.mxu1 %v246_v61 }
 0x1ab   :  { %v241_v63 = vpop.f32.mrf.mxu1 }
 0x1ac   :  { %v242_v0 = vadd.f32 %v351_v62, %v241_v63 }
 0x1ad   :  { %v445_v1 = vpop.f32.mrf.mxu1 }
 0x1ae   :  { %v245_v2 = vmax.f32 %v242_v0, 0.0 }
 0x1b0   :  { %459 = vmatmul.mubr.msk.f32.vlgmr.msra.gmra.mxu1 %vm259_vm2, %v245_v2 }
 0x270   :  { %v329_v4 = vpop.f32.mrf.mxu1 }
 0x271   :  { %v330_v5 = vadd.f32 %v353_v3, %v329_v4 }
 0x272   :  { %v460_v6 = vpop.f32.mrf.mxu1 }
 0x273   :  { %334 = vst.msk [vmem:[#allocation2] sm:$0x3] %vm333_vm3, %v330_v5 }
 0x274   :  { %475 = shalt.err (!%p472_p4)
}
 0x275   :  { %344 = dma.vmem_to_hbm [thread:$0]  %s342_s17, 32, %s738_s7, [#allocation3]  }
 0x276   :  { %484 = dma.done.wait [#allocation3], 32  }
 0x277   :  { %485 = vsyncadd [#allocation3], 4294967264 }
 0x278   :  { %348 = vsyncpa [#allocation3], 1 }

</bundles_post_ra>
